<compile_context>
chip_gen: v7x
topology: tpu7x:2x2x1
jax: 0.10.0
libtpu: 0.0.40
codegen_flags: <defaults>
</compile_context>

<pallas_src>
import functools

import jax
import jax.numpy as jnp
from jax.experimental import pallas as pl
from jax.experimental.pallas import tpu as pltpu

# ----------------------------------------------------------------------------
# Static layer configuration.
# ----------------------------------------------------------------------------
DIMS = [28 * 28, 128, 64, 12, 3, 12, 64, 128, 28 * 28]
NUM_LAYERS = len(DIMS) - 1        # 8 PyTorch linear layers
D_IN = DIMS[0]                    # 784
D_OUT = DIMS[-1]                  # 784


def _round_up(x, m):
    return ((x + m - 1) // m) * m


# Kernel layers after merging PyTorch layers 3 & 4 (12->3 then 3->12, no
# activation between them): 7 layers, ReLU after all but the last, Sigmoid
# after the last.
K_IN = [784, 128, 64, 12, 12, 64, 128]
K_OUT = [128, 64, 12, 12, 64, 128, 784]
NUM_KLAYERS = len(K_IN)           # 7

# Concatenated-bias buffer: each segment lane-aligned (multiple of 128).
BIAS_SEG = [_round_up(o, 128) for o in K_OUT]          # [128]*6 + [896]
BIAS_OFF = [sum(BIAS_SEG[:l]) for l in range(NUM_KLAYERS)]
BIAS_TOTAL = sum(BIAS_SEG)                              # 1664


def _vmem_capacity_bytes():
    """Per-core VMEM capacity; conservative fallback = 64 MiB (v7x per-TC)."""
    try:
        info = pltpu.get_tpu_info()
        cap = getattr(info, "vmem_capacity_bytes", None)
        if cap:
            return int(cap)
    except Exception:
        pass
    return 64 << 20


def _default_act_dtype():
    """bf16 EUP (exp) only on chips with bf16 VPU/EUP (v6e / v7x)."""
    try:
        kind = jax.devices()[0].device_kind.lower()
    except Exception:
        kind = ""
    if ("v6" in kind) or ("v7" in kind):
        return jnp.bfloat16
    return jnp.float32


_VMEM_CAP = _vmem_capacity_bytes()
_ACT_DTYPE = _default_act_dtype()


# ----------------------------------------------------------------------------
# Kernel.
# ----------------------------------------------------------------------------
def _autoencoder_kernel(x_ref, *refs, act_dtype):
    """Fused 7-layer forward pass for one batch tile.

    refs layout: w0..w6 (bf16, [in, out]), bias_buf (f32, [1, BIAS_TOTAL]),
    out_ref.  All weights/biases (<0.5 MB bf16) stay VMEM-resident; layers run
    back-to-back on the MXU with f32 accumulation.
    """
    w_refs = refs[:NUM_KLAYERS]
    bias_ref = refs[NUM_KLAYERS]
    out_ref = refs[NUM_KLAYERS + 1]

    h = x_ref[...].astype(jnp.bfloat16)         # no-op if x already bf16
    for l in range(NUM_KLAYERS):
        w = w_refs[l][...]                                           # bf16
        b = bias_ref[:, BIAS_OFF[l]:BIAS_OFF[l] + K_OUT[l]]          # f32 [1,out]
        h = jnp.dot(h, w, preferred_element_type=jnp.float32) + b
        if l < NUM_KLAYERS - 1:
            # ReLU (exact in any dtype); cast to bf16 for the next MXU matmul.
            h = jnp.maximum(h, 0.0).astype(jnp.bfloat16)
        else:
            # Sigmoid: exp on the EUP in act_dtype (bf16 on v6e/v7x, f32 on
            # v5e), reciprocal kept in f32 for numerical safety everywhere.
            e = jnp.exp(-(h.astype(act_dtype))).astype(jnp.float32)
            h = 1.0 / (1.0 + e)

    out_ref[...] = h.astype(out_ref.dtype)


def _vmem_limit_bytes(tile, x_bytes, out_bytes):
    """Scoped-VMEM budget for the chosen tile, capped below physical VMEM."""
    io = 2 * tile * D_IN * x_bytes + 2 * tile * D_OUT * out_bytes   # dbl-buffered
    w = 2 * sum(K_IN[l] * K_OUT[l] for l in range(NUM_KLAYERS)) * 2  # bf16 x2
    b = 2 * BIAS_TOTAL * 4
    act = 2 * tile * (D_OUT + 256) * 4                               # intermediates
    est = int((io + w + b + act) * 1.3)
    hard_cap = int(_VMEM_CAP * 0.75)
    return max(min(est, hard_cap), min(32 << 20, hard_cap))


# ----------------------------------------------------------------------------
# Wrapper.
# ----------------------------------------------------------------------------
@functools.partial(jax.jit, static_argnames=("batch_tile", "out_dtype"))
def autoencoder_forward(x, weights, biases, batch_tile=1024, out_dtype=None):
    """x: [B, 784] (f32 or bf16). weights[i]: [in, out] f32. biases[i]: [1, out] f32."""
    B, D = x.shape
    assert D == D_IN
    out_dtype = x.dtype if out_dtype is None else out_dtype

    # Batch tile: multiple of 16 (bf16 sublane pack), clamped to the batch.
    tile = max(16, min(batch_tile, _round_up(B, 16)))
    tile = _round_up(tile, 16)
    B_pad = _round_up(B, tile)
    if B_pad != B:
        x = jnp.pad(x, ((0, B_pad - B), (0, 0)))

    # Merge the activation-free bottleneck (layers 3 & 4) in f32, then cast.
    w34 = weights[3] @ weights[4]                       # [12, 12]
    b34 = biases[3] @ weights[4] + biases[4]            # [1, 12]
    kw = [weights[0], weights[1], weights[2], w34, weights[5], weights[6], weights[7]]
    kb = [biases[0], biases[1], biases[2], b34, biases[5], biases[6], biases[7]]

    kw = [w.astype(jnp.bfloat16) for w in kw]

    # One concatenated f32 bias buffer, lane-aligned segments.
    segs = []
    for l in range(NUM_KLAYERS):
        seg = kb[l].astype(jnp.float32)
        pad = BIAS_SEG[l] - K_OUT[l]
        if pad:
            seg = jnp.pad(seg, ((0, 0), (0, pad)))
        segs.append(seg)
    bias_buf = jnp.concatenate(segs, axis=1)            # [1, BIAS_TOTAL]

    grid = (B_pad // tile,)

    in_specs = [pl.BlockSpec((tile, D_IN), lambda i: (i, 0))]
    for l in range(NUM_KLAYERS):
        in_specs.append(pl.BlockSpec((K_IN[l], K_OUT[l]), lambda i: (0, 0)))
    in_specs.append(pl.BlockSpec((1, BIAS_TOTAL), lambda i: (0, 0)))

    out_spec = pl.BlockSpec((tile, D_OUT), lambda i: (i, 0))

    x_bytes = jnp.dtype(x.dtype).itemsize
    out_bytes = jnp.dtype(out_dtype).itemsize

    out = pl.pallas_call(
        functools.partial(_autoencoder_kernel, act_dtype=_ACT_DTYPE),
        out_shape=jax.ShapeDtypeStruct((B_pad, D_OUT), out_dtype),
        grid_spec=pltpu.PrefetchScalarGridSpec(
            num_scalar_prefetch=0,
            grid=grid,
            in_specs=in_specs,
            out_specs=out_spec,
        ),
        compiler_params=pltpu.CompilerParams(
            dimension_semantics=("parallel",),
            vmem_limit_bytes=_vmem_limit_bytes(tile, x_bytes, out_bytes),
        ),
    )(x, *kw, bias_buf)

    if B_pad != B:
        out = out[:B]
    return out


# ----------------------------------------------------------------------------
# Params + references.
# ----------------------------------------------------------------------------
def init_params(key):
    """PyTorch nn.Linear default init: U(-1/sqrt(fan_in), 1/sqrt(fan_in))."""
    weights, biases = [], []
    for l in range(NUM_LAYERS):
        fan_in, fan_out = DIMS[l], DIMS[l + 1]
        key, kw_, kb_ = jax.random.split(key, 3)
        bound = 1.0 / jnp.sqrt(fan_in)
        w = jax.random.uniform(kw_, (fan_in, fan_out), jnp.float32,
                               minval=-bound, maxval=bound)
        b = jax.random.uniform(kb_, (1, fan_out), jnp.float32,
                               minval=-bound, maxval=bound)
        weights.append(w)
        biases.append(b)
    return weights, biases


def reference_kernel_math(x, weights, biases, act_dtype=_ACT_DTYPE):
    """Plain-JAX reference mirroring the kernel's exact numerics
    (merged bottleneck, bf16 matmuls with f32 accumulation, act dtype)."""
    w34 = weights[3] @ weights[4]
    b34 = biases[3] @ weights[4] + biases[4]
    kw = [weights[0], weights[1], weights[2], w34, weights[5], weights[6], weights[7]]
    kb = [biases[0], biases[1], biases[2], b34, biases[5], biases[6], biases[7]]
    h = x.astype(jnp.bfloat16)
    for l in range(NUM_KLAYERS):
        h = jnp.dot(h, kw[l].astype(jnp.bfloat16),
                    preferred_element_type=jnp.float32) + kb[l]
        if l < NUM_KLAYERS - 1:
            h = jnp.maximum(h, 0.0).astype(jnp.bfloat16)
        else:
            e = jnp.exp(-(h.astype(act_dtype))).astype(jnp.float32)
            h = 1.0 / (1.0 + e)
    return h


def reference_forward_f32(x, weights, biases):
    """Full-precision reference (matches the PyTorch module in f32)."""
    h = x.astype(jnp.float32)
    for l in range(NUM_LAYERS):
        h = h @ weights[l] + biases[l]
        if l in (0, 1, 2, 4, 5, 6):
            h = jnp.maximum(h, 0.0)
        elif l == NUM_LAYERS - 1:
            h = jax.nn.sigmoid(h)
    return h


# ----------------------------------------------------------------------------
# Demo / self-test.
# ----------------------------------------------------------------------------
if __name__ == "__main__":
    key = jax.random.PRNGKey(0)
    key, kx = jax.random.split(key)

    B = 64                       # small demo batch; batch_tile=32 -> 2 grid steps
    x = jax.random.uniform(kx, (B, 28 * 28), jnp.float32)
    weights, biases = init_params(key)

    # f32 in / f32 out path (matches module dtype semantics).
    out = autoencoder_forward(x, weights, biases, batch_tile=32)
    out = jax.block_until_ready(out)
    assert out.shape == (B, D_OUT)
    assert out.dtype == x.dtype

    # Tight check against a reference using the same kernel math.
    ref_k = reference_kernel_math(x, weights, biases)
    assert jnp.allclose(out, ref_k, atol=1e-2, rtol=1e-2)

    # Loose sanity check against the full-f32 PyTorch-equivalent forward.
    ref_f32 = reference_forward_f32(x, weights, biases)
    assert jnp.allclose(out, ref_f32, atol=3e-2, rtol=3e-2)

    # bf16 in / bf16 out path (halves HBM traffic; producer supplies bf16).
    out_bf = autoencoder_forward(x.astype(jnp.bfloat16), weights, biases,
                                 batch_tile=32, out_dtype=jnp.bfloat16)
    out_bf = jax.block_until_ready(out_bf)
    assert out_bf.shape == (B, D_OUT)
    assert out_bf.dtype == jnp.bfloat16
    assert jnp.allclose(out_bf.astype(jnp.float32), ref_f32, atol=5e-2, rtol=5e-2)

    print("KERNEL_OK")
</pallas_src>

<mosaic_0001>
module attributes {stable_mosaic.version = 11 : i64} {
  func.func @_autoencoder_kernel(%arg0: i32, %arg1: memref<32x784xf32, #tpu.memory_space<vmem>>, %arg2: memref<784x128xbf16, #tpu.memory_space<vmem>>, %arg3: memref<128x64xbf16, #tpu.memory_space<vmem>>, %arg4: memref<64x12xbf16, #tpu.memory_space<vmem>>, %arg5: memref<12x12xbf16, #tpu.memory_space<vmem>>, %arg6: memref<12x64xbf16, #tpu.memory_space<vmem>>, %arg7: memref<64x128xbf16, #tpu.memory_space<vmem>>, %arg8: memref<128x784xbf16, #tpu.memory_space<vmem>>, %arg9: memref<1x1664xf32, #tpu.memory_space<vmem>>, %arg10: memref<32x784xf32, #tpu.memory_space<vmem>>) attributes {dimension_semantics = [#tpu.dimension_semantics<parallel>], iteration_bounds = array<i64: 2>, scalar_prefetch = 0 : i64, scratch_operands = 0 : i64, tpu.core_type = #tpu.core_type<tc>, window_params = [{transform_indices = @transform_0, window_bounds = array<i64: 32, 784>}, {pipeline_mode = #tpu.pipeline_mode<synchronous>, transform_indices = @transform_1, window_bounds = array<i64: 784, 128>}, {pipeline_mode = #tpu.pipeline_mode<synchronous>, transform_indices = @transform_2, window_bounds = array<i64: 128, 64>}, {pipeline_mode = #tpu.pipeline_mode<synchronous>, transform_indices = @transform_3, window_bounds = array<i64: 64, 12>}, {pipeline_mode = #tpu.pipeline_mode<synchronous>, transform_indices = @transform_4, window_bounds = array<i64: 12, 12>}, {pipeline_mode = #tpu.pipeline_mode<synchronous>, transform_indices = @transform_5, window_bounds = array<i64: 12, 64>}, {pipeline_mode = #tpu.pipeline_mode<synchronous>, transform_indices = @transform_6, window_bounds = array<i64: 64, 128>}, {pipeline_mode = #tpu.pipeline_mode<synchronous>, transform_indices = @transform_7, window_bounds = array<i64: 128, 784>}, {pipeline_mode = #tpu.pipeline_mode<synchronous>, transform_indices = @transform_8, window_bounds = array<i64: 1, 1664>}, {transform_indices = @transform_9, window_bounds = array<i64: 32, 784>}]} {
    %c0 = arith.constant 0 : index
    %c0_0 = arith.constant 0 : index
    %0 = vector.load %arg1[%c0, %c0_0] : memref<32x784xf32, #tpu.memory_space<vmem>>, vector<32x784xf32>
    %1 = arith.truncf %0 : vector<32x784xf32> to vector<32x784xbf16>
    %c0_1 = arith.constant 0 : index
    %c0_2 = arith.constant 0 : index
    %2 = vector.load %arg2[%c0_1, %c0_2] : memref<784x128xbf16, #tpu.memory_space<vmem>>, vector<784x128xbf16>
    %c0_3 = arith.constant 0 : index
    %c0_4 = arith.constant 0 : index
    %3 = vector.load %arg9[%c0_3, %c0_4] : memref<1x1664xf32, #tpu.memory_space<vmem>>, vector<1x128xf32>
    %cst = arith.constant dense<0.000000e+00> : vector<32x128xf32>
    %4 = tpu.matmul %1, %2, %cst {dimension_numbers = #tpu.dot_dimension_numbers<[1], [0], [0], [1], [0, 0, 1, 1], [], []>} : vector<32x784xbf16>, vector<784x128xbf16>, vector<32x128xf32> -> vector<32x128xf32>
    %5 = vector.broadcast %3 : vector<1x128xf32> to vector<32x128xf32>
    %6 = arith.addf %4, %5 : vector<32x128xf32>
    %cst_5 = arith.constant 0.000000e+00 : f32
    %7 = vector.broadcast %cst_5 : f32 to vector<32x128xf32>
    %8 = arith.maximumf %6, %7 : vector<32x128xf32>
    %9 = arith.truncf %8 : vector<32x128xf32> to vector<32x128xbf16>
    %c0_6 = arith.constant 0 : index
    %c0_7 = arith.constant 0 : index
    %10 = vector.load %arg3[%c0_6, %c0_7] : memref<128x64xbf16, #tpu.memory_space<vmem>>, vector<128x64xbf16>
    %c0_8 = arith.constant 0 : index
    %c128 = arith.constant 128 : index
    %11 = vector.load %arg9[%c0_8, %c128] : memref<1x1664xf32, #tpu.memory_space<vmem>>, vector<1x64xf32>
    %cst_9 = arith.constant dense<0.000000e+00> : vector<32x64xf32>
    %12 = tpu.matmul %9, %10, %cst_9 {dimension_numbers = #tpu.dot_dimension_numbers<[1], [0], [0], [1], [0, 0, 1, 1], [], []>} : vector<32x128xbf16>, vector<128x64xbf16>, vector<32x64xf32> -> vector<32x64xf32>
    %13 = vector.broadcast %11 : vector<1x64xf32> to vector<32x64xf32>
    %14 = arith.addf %12, %13 : vector<32x64xf32>
    %cst_10 = arith.constant 0.000000e+00 : f32
    %15 = vector.broadcast %cst_10 : f32 to vector<32x64xf32>
    %16 = arith.maximumf %14, %15 : vector<32x64xf32>
    %17 = arith.truncf %16 : vector<32x64xf32> to vector<32x64xbf16>
    %c0_11 = arith.constant 0 : index
    %c0_12 = arith.constant 0 : index
    %18 = vector.load %arg4[%c0_11, %c0_12] : memref<64x12xbf16, #tpu.memory_space<vmem>>, vector<64x12xbf16>
    %c0_13 = arith.constant 0 : index
    %c256 = arith.constant 256 : index
    %19 = vector.load %arg9[%c0_13, %c256] : memref<1x1664xf32, #tpu.memory_space<vmem>>, vector<1x12xf32>
    %cst_14 = arith.constant dense<0.000000e+00> : vector<32x12xf32>
    %20 = tpu.matmul %17, %18, %cst_14 {dimension_numbers = #tpu.dot_dimension_numbers<[1], [0], [0], [1], [0, 0, 1, 1], [], []>} : vector<32x64xbf16>, vector<64x12xbf16>, vector<32x12xf32> -> vector<32x12xf32>
    %21 = vector.broadcast %19 : vector<1x12xf32> to vector<32x12xf32>
    %22 = arith.addf %20, %21 : vector<32x12xf32>
    %cst_15 = arith.constant 0.000000e+00 : f32
    %23 = vector.broadcast %cst_15 : f32 to vector<32x12xf32>
    %24 = arith.maximumf %22, %23 : vector<32x12xf32>
    %25 = arith.truncf %24 : vector<32x12xf32> to vector<32x12xbf16>
    %c0_16 = arith.constant 0 : index
    %c0_17 = arith.constant 0 : index
    %26 = vector.load %arg5[%c0_16, %c0_17] : memref<12x12xbf16, #tpu.memory_space<vmem>>, vector<12x12xbf16>
    %c0_18 = arith.constant 0 : index
    %c384 = arith.constant 384 : index
    %27 = vector.load %arg9[%c0_18, %c384] : memref<1x1664xf32, #tpu.memory_space<vmem>>, vector<1x12xf32>
    %cst_19 = arith.constant dense<0.000000e+00> : vector<32x12xf32>
    %28 = tpu.matmul %25, %26, %cst_19 {dimension_numbers = #tpu.dot_dimension_numbers<[1], [0], [0], [1], [0, 0, 1, 1], [], []>} : vector<32x12xbf16>, vector<12x12xbf16>, vector<32x12xf32> -> vector<32x12xf32>
    %29 = vector.broadcast %27 : vector<1x12xf32> to vector<32x12xf32>
    %30 = arith.addf %28, %29 : vector<32x12xf32>
    %cst_20 = arith.constant 0.000000e+00 : f32
    %31 = vector.broadcast %cst_20 : f32 to vector<32x12xf32>
    %32 = arith.maximumf %30, %31 : vector<32x12xf32>
    %33 = arith.truncf %32 : vector<32x12xf32> to vector<32x12xbf16>
    %c0_21 = arith.constant 0 : index
    %c0_22 = arith.constant 0 : index
    %34 = vector.load %arg6[%c0_21, %c0_22] : memref<12x64xbf16, #tpu.memory_space<vmem>>, vector<12x64xbf16>
    %c0_23 = arith.constant 0 : index
    %c512 = arith.constant 512 : index
    %35 = vector.load %arg9[%c0_23, %c512] : memref<1x1664xf32, #tpu.memory_space<vmem>>, vector<1x64xf32>
    %cst_24 = arith.constant dense<0.000000e+00> : vector<32x64xf32>
    %36 = tpu.matmul %33, %34, %cst_24 {dimension_numbers = #tpu.dot_dimension_numbers<[1], [0], [0], [1], [0, 0, 1, 1], [], []>} : vector<32x12xbf16>, vector<12x64xbf16>, vector<32x64xf32> -> vector<32x64xf32>
    %37 = vector.broadcast %35 : vector<1x64xf32> to vector<32x64xf32>
    %38 = arith.addf %36, %37 : vector<32x64xf32>
    %cst_25 = arith.constant 0.000000e+00 : f32
    %39 = vector.broadcast %cst_25 : f32 to vector<32x64xf32>
    %40 = arith.maximumf %38, %39 : vector<32x64xf32>
    %41 = arith.truncf %40 : vector<32x64xf32> to vector<32x64xbf16>
    %c0_26 = arith.constant 0 : index
    %c0_27 = arith.constant 0 : index
    %42 = vector.load %arg7[%c0_26, %c0_27] : memref<64x128xbf16, #tpu.memory_space<vmem>>, vector<64x128xbf16>
    %c0_28 = arith.constant 0 : index
    %c640 = arith.constant 640 : index
    %43 = vector.load %arg9[%c0_28, %c640] : memref<1x1664xf32, #tpu.memory_space<vmem>>, vector<1x128xf32>
    %cst_29 = arith.constant dense<0.000000e+00> : vector<32x128xf32>
    %44 = tpu.matmul %41, %42, %cst_29 {dimension_numbers = #tpu.dot_dimension_numbers<[1], [0], [0], [1], [0, 0, 1, 1], [], []>} : vector<32x64xbf16>, vector<64x128xbf16>, vector<32x128xf32> -> vector<32x128xf32>
    %45 = vector.broadcast %43 : vector<1x128xf32> to vector<32x128xf32>
    %46 = arith.addf %44, %45 : vector<32x128xf32>
    %cst_30 = arith.constant 0.000000e+00 : f32
    %47 = vector.broadcast %cst_30 : f32 to vector<32x128xf32>
    %48 = arith.maximumf %46, %47 : vector<32x128xf32>
    %49 = arith.truncf %48 : vector<32x128xf32> to vector<32x128xbf16>
    %c0_31 = arith.constant 0 : index
    %c0_32 = arith.constant 0 : index
    %50 = vector.load %arg8[%c0_31, %c0_32] : memref<128x784xbf16, #tpu.memory_space<vmem>>, vector<128x784xbf16>
    %c0_33 = arith.constant 0 : index
    %c768 = arith.constant 768 : index
    %51 = vector.load %arg9[%c0_33, %c768] : memref<1x1664xf32, #tpu.memory_space<vmem>>, vector<1x784xf32>
    %cst_34 = arith.constant dense<0.000000e+00> : vector<32x784xf32>
    %52 = tpu.matmul %49, %50, %cst_34 {dimension_numbers = #tpu.dot_dimension_numbers<[1], [0], [0], [1], [0, 0, 1, 1], [], []>} : vector<32x128xbf16>, vector<128x784xbf16>, vector<32x784xf32> -> vector<32x784xf32>
    %53 = vector.broadcast %51 : vector<1x784xf32> to vector<32x784xf32>
    %54 = arith.addf %52, %53 : vector<32x784xf32>
    %cst_35 = arith.constant 0.000000e+00 : f32
    %55 = vector.broadcast %cst_35 : f32 to vector<32x784xf32>
    %56 = arith.subf %55, %54 : vector<32x784xf32>
    %57 = math.exp %56 : vector<32x784xf32>
    %cst_36 = arith.constant 1.000000e+00 : f32
    %58 = vector.broadcast %cst_36 : f32 to vector<32x784xf32>
    %59 = arith.addf %58, %57 : vector<32x784xf32>
    %cst_37 = arith.constant 1.000000e+00 : f32
    %60 = vector.broadcast %cst_37 : f32 to vector<32x784xf32>
    %61 = arith.divf %60, %59 : vector<32x784xf32>
    %c0_38 = arith.constant 0 : index
    %c0_39 = arith.constant 0 : index
    %62 = vector.load %arg10[%c0_38, %c0_39] : memref<32x784xf32, #tpu.memory_space<vmem>>, vector<32x784xf32>
    tpu.vector_store %arg10[%c0_38, %c0_39], %61 {strides = array<i32>} : memref<32x784xf32, #tpu.memory_space<vmem>>, vector<32x784xf32>,
    return
  }
  func.func @transform_0(%arg0: i32) -> (i32, i32) {
    %c0_i32 = arith.constant 0 : i32
    %c0_i32_0 = arith.constant 0 : i32
    return %arg0, %c0_i32 : i32, i32
  }
  func.func @transform_1(%arg0: i32) -> (i32, i32) {
    %c0_i32 = arith.constant 0 : i32
    %c0_i32_0 = arith.constant 0 : i32
    %c0_i32_1 = arith.constant 0 : i32
    return %c0_i32, %c0_i32_0 : i32, i32
  }
  func.func @transform_2(%arg0: i32) -> (i32, i32) {
    %c0_i32 = arith.constant 0 : i32
    %c0_i32_0 = arith.constant 0 : i32
    %c0_i32_1 = arith.constant 0 : i32
    return %c0_i32, %c0_i32_0 : i32, i32
  }
  func.func @transform_3(%arg0: i32) -> (i32, i32) {
    %c0_i32 = arith.constant 0 : i32
    %c0_i32_0 = arith.constant 0 : i32
    %c0_i32_1 = arith.constant 0 : i32
    return %c0_i32, %c0_i32_0 : i32, i32
  }
  func.func @transform_4(%arg0: i32) -> (i32, i32) {
    %c0_i32 = arith.constant 0 : i32
    %c0_i32_0 = arith.constant 0 : i32
    %c0_i32_1 = arith.constant 0 : i32
    return %c0_i32, %c0_i32_0 : i32, i32
  }
  func.func @transform_5(%arg0: i32) -> (i32, i32) {
    %c0_i32 = arith.constant 0 : i32
    %c0_i32_0 = arith.constant 0 : i32
    %c0_i32_1 = arith.constant 0 : i32
    return %c0_i32, %c0_i32_0 : i32, i32
  }
  func.func @transform_6(%arg0: i32) -> (i32, i32) {
    %c0_i32 = arith.constant 0 : i32
    %c0_i32_0 = arith.constant 0 : i32
    %c0_i32_1 = arith.constant 0 : i32
    return %c0_i32, %c0_i32_0 : i32, i32
  }
  func.func @transform_7(%arg0: i32) -> (i32, i32) {
    %c0_i32 = arith.constant 0 : i32
    %c0_i32_0 = arith.constant 0 : i32
    %c0_i32_1 = arith.constant 0 : i32
    return %c0_i32, %c0_i32_0 : i32, i32
  }
  func.func @transform_8(%arg0: i32) -> (i32, i32) {
    %c0_i32 = arith.constant 0 : i32
    %c0_i32_0 = arith.constant 0 : i32
    %c0_i32_1 = arith.constant 0 : i32
    return %c0_i32, %c0_i32_0 : i32, i32
  }
  func.func @transform_9(%arg0: i32) -> (i32, i32) {
    %c0_i32 = arith.constant 0 : i32
    %c0_i32_0 = arith.constant 0 : i32
    return %arg0, %c0_i32 : i32, i32
  }
}

</mosaic_0001>

<bundles_post_ra>
// kernel: autoencoder_forward.1
= control target key start
LH: loop header
LB: loop body
LE: loop exit
PB: predicated region body
PF: predicated region fallthrough
CT: control target
= control target key end

     0   :  { %14 = vsyncpa [#allocation3], 0  ;;  %s3762_s0 = inlined_call_operand.vmem [shape: f32[64,784], index: 0, kind: input, shape index: {}]   ;;  %s3763_s1 = inlined_call_operand.vmem [shape: bf16[784,128], index: 1, kind: input, shape index: {}]   ;;  %s3764_s2 = inlined_call_operand.vmem [shape: bf16[128,64], index: 2, kind: input, shape index: {}]   ;;  %s3765_s3 = inlined_call_operand.vmem [shape: bf16[64,12], index: 3, kind: input, shape index: {}]   ;;  %s3766_s4 = inlined_call_operand.vmem [shape: bf16[12,12], index: 4, kind: input, shape index: {}]   ;;  %s3767_s5 = inlined_call_operand.vmem [shape: bf16[12,64], index: 5, kind: input, shape index: {}]   ;;  %s3768_s6 = inlined_call_operand.vmem [shape: bf16[64,128], index: 6, kind: input, shape index: {}]   ;;  %s3769_s7 = inlined_call_operand.vmem [shape: bf16[128,784], index: 7, kind: input, shape index: {}]   ;;  %s3770_s8 = inlined_call_operand.vmem [shape: f32[1,1664], index: 8, kind: input, shape index: {}]   ;;  %s3771_s9 = inlined_call_operand.hbm [shape: f32[64,784], index: 9, kind: output, shape index: {}]  }
   0x1   :  { %16 = vsyncpa [#allocation3 + $0x1], 0  ;;  %s3124_s30 = smov 0   ;;  %s3126_s10 = smov 0  }
   0x2   :  { %s3128_s11 = smov 0   ;;  %s3130_s12 = smov 0  }
   0x3 LB: > { %s3145_s13 = sadd.s32 4294967295, %s3068_s12   ;;  %s2343_s14 = sadd.s32 4294967294, %s3068_s12   ;;  %s3068_s12 = sphi %s3130_s12, %s3777_s12   ;;  %s3064_s11 = sphi %s3128_s11, %s3776_s11   ;;  %s3060_s10 = sphi %s3126_s10, %s3775_s10   ;;  %s3056_s30 = sphi %s3124_s30, %s3774_s30  }
   0x4   : > { %s3149_s15 = sadd.s32 1, %s3068_s12   ;;  %s223_s16 = sadd.s32 1, %s3064_s11 }
   0x5   : > { %s220_s17 = ssub.s32 %s3068_s12, %s3149_s15  ;;  %p233_p0 = scmp.ne.s32.totalorder %s3064_s11, %s3060_s10 }
   0x6   : > { %p221_p1 = scmp.eq.s32.totalorder %s220_s17, 0  ;;  %p234_p2 = scmp.eq.s32.totalorder %s3145_s13, 1 }
   0x7   : > { %p239_p3 = scmp.ne.s32.totalorder %s3060_s10, %s3056_s30  ;;  %p240_p4 = scmp.eq.s32.totalorder %s2343_s14, 1 }
   0x8   : > { %s3160_s18 = scalar_select %p221_p1, %s3064_s11, %s223_s16  }
   0x9   : > { %p3162_p5 = por %p234_p2, %p233_p0  ;;  %p3166_p6 = por %p240_p4, %p239_p3 }
   0xa   : > { %p2346_p7 = scmp.ge.s32.totalorder %s3068_s12, 1  ;;  %p292_p8 = scmp.lt.s32.totalorder %s3068_s12, 3 }
   0xc   : > { %p293_p9 = pnand %p2346_p7, %p292_p8 }
   0xd   : > { %v2747_v0 = vld [vmem:[%s3763_s1 + $0x40] sm:$0xff] (!%p293_p9)   ;;  %v2751_v4 = vld [vmem:[%s3763_s1 + $0x48] sm:$0xff] (!%p293_p9)   ;;  %v2755_v8 = vld [vmem:[%s3763_s1 + $0x50] sm:$0xff] (!%p293_p9)   ;;  %s2347_s25 = sshll.u32 (!%p293_p9), %s3145_s13, 2  ;;  %vm779_vm0 = vcmask (!%p293_p9), 130048   ;;  %vm1153_vm1 = vcmask (!%p293_p9), 523264  }
   0xe   : > { %296 = sbr.rel (%p293_p9) target bundleno = 1732 (0x6c4), region = 56  ;;  %v2748_v1 = vld [vmem:[%s3763_s1] sm:$0xff] (!%p293_p9)   ;;  %2493 = vmatprep.subr.bf16.mxu0 (!%p293_p9), %v2747_v0  ;;  %v2752_v5 = vld [vmem:[%s3763_s1 + $0x8] sm:$0xff] (!%p293_p9)   ;;  %v2756_v9 = vld [vmem:[%s3763_s1 + $0x10] sm:$0xff] (!%p293_p9)   ;;  %p330_p10 = scmp.lt.s32.totalorder (!%p293_p9), %s2347_s25, 7  ;;  %vm1236_vm2 = vcmask (!%p293_p9), 1045504  }
   0xf   : > { %v2749_v2 = vld [vmem:[%s3763_s1 + $0xc0] sm:$0xff] (!%p293_p9)   ;;  %2494 = vmatpush3.bf16.msra.mxu0 (!%p293_p9), %v2748_v1  ;;  %v2753_v6 = vld [vmem:[%s3763_s1 + $0xc8] sm:$0xff] (!%p293_p9)   ;;  %v2757_v10 = vld [vmem:[%s3763_s1 + $0xd0] sm:$0xff] (!%p293_p9)   ;;  %vm1229_vm3 = vcmask (!%p293_p9), 97280  }
  0x10   : > { %v2750_v3 = vld [vmem:[%s3763_s1 + $0x80] sm:$0xff] (!%p293_p9)   ;;  %2521 = vmatprep.subr.bf16.mxu1 (!%p293_p9), %v2749_v2  ;;  %2495 = vmatprep.subr.bf16.mxu0 (!%p293_p9), %v2751_v4  ;;  %v2754_v7 = vld [vmem:[%s3763_s1 + $0x88] sm:$0xff] (!%p293_p9)   ;;  %v2758_v11 = vld [vmem:[%s3763_s1 + $0x90] sm:$0xff] (!%p293_p9)  }
  0x11   : > { %2522 = vmatpush3.bf16.msra.mxu1 (!%p293_p9), %v2750_v3  ;;  %v2759_v12 = vld [vmem:[%s3763_s1 + $0x58] sm:$0xff] (!%p293_p9)   ;;  %v2763_v16 = vld [vmem:[%s3763_s1 + $0x60] sm:$0xff] (!%p293_p9)   ;;  %v2767_v20 = vld [vmem:[%s3763_s1 + $0x68] sm:$0xff] (!%p293_p9)  }
  0x12   : > { %2523 = vmatprep.subr.bf16.mxu1 (!%p293_p9), %v2753_v6  ;;  %v2760_v13 = vld [vmem:[%s3763_s1 + $0x18] sm:$0xff] (!%p293_p9)   ;;  %v2764_v17 = vld [vmem:[%s3763_s1 + $0x20] sm:$0xff] (!%p293_p9)   ;;  %v2768_v21 = vld [vmem:[%s3763_s1 + $0x28] sm:$0xff] (!%p293_p9)  }
  0x13   : > { %2496 = vmatpush3.bf16.msra.mxu0 (!%p293_p9), %v2752_v5  ;;  %v2761_v14 = vld [vmem:[%s3763_s1 + $0xd8] sm:$0xff] (!%p293_p9)   ;;  %v2765_v18 = vld [vmem:[%s3763_s1 + $0xe0] sm:$0xff] (!%p293_p9)   ;;  %v2769_v22 = vld [vmem:[%s3763_s1 + $0xe8] sm:$0xff] (!%p293_p9)  }
  0x14   : > { %2497 = vmatprep.subr.bf16.mxu0 (!%p293_p9), %v2755_v8  ;;  %v2762_v15 = vld [vmem:[%s3763_s1 + $0x98] sm:$0xff] (!%p293_p9)   ;;  %v2766_v19 = vld [vmem:[%s3763_s1 + $0xa0] sm:$0xff] (!%p293_p9)   ;;  %v2770_v23 = vld [vmem:[%s3763_s1 + $0xa8] sm:$0xff] (!%p293_p9)  }
  0x15   : > { %2524 = vmatpush3.bf16.msra.mxu1 %v2754_v7  ;;  %s3779_s25 = smov (!%p330_p10, %s2347_s25), 7  ;;  %v2771_v24 = vld [vmem:[%s3763_s1 + $0x70] sm:$0xff]   ;;  %v2775_v28 = vld [vmem:[%s3763_s1 + $0x78] sm:$0xff]   ;;  %v2779_v38 = vld [vmem:[%s3763_s1 + $0x140] sm:$0xff]  }
  0x16   : > { %2525 = vmatprep.subr.bf16.mxu1 %v2757_v10  ;;  %s2703_s26 = smul.u32 56, %s3779_s25  ;;  %v2772_v25 = vld [vmem:[%s3763_s1 + $0x30] sm:$0xff]   ;;  %v2776_v29 = vld [vmem:[%s3763_s1 + $0x38] sm:$0xff]   ;;  %v2780_v42 = vld [vmem:[%s3763_s1 + $0x100] sm:$0xff]  }
  0x17   : > { %2498 = vmatpush3.bf16.msra.mxu0 %v2756_v9  ;;  %v2773_v26 = vld [vmem:[%s3763_s1 + $0xf0] sm:$0xff]   ;;  %v2777_v30 = vld [vmem:[%s3763_s1 + $0xf8] sm:$0xff]   ;;  %v2781_v46 = vld [vmem:[%s3763_s1 + $0x148] sm:$0xff]  }
  0x18   : > { %2499 = vmatprep.subr.bf16.mxu0 %v2759_v12  ;;  %v2774_v27 = vld [vmem:[%s3763_s1 + $0xb0] sm:$0xff]   ;;  %s3263_s24 = scalar_lea.vmem %s3762_s0, %s2703_s26  ;;  %v2778_v34 = vld [vmem:[%s3763_s1 + $0xb8] sm:$0xff]   ;;  %v2782_v47 = vld [vmem:[%s3763_s1 + $0x108] sm:$0xff]   ;;  %s2704_s26 = smul.u32 3584, %s3145_s13 }
  0x19   : > { %2526 = vmatpush3.bf16.msra.mxu1 %v2758_v11  ;;  %v339_v31 = vld [vmem:[%s3263_s24 + $0x8] sm:$0xff]  ;;  %v346_v32 = vld [vmem:[%s3263_s24 + $0x40] sm:$0xff]  ;;  %v345_v36 = vld [vmem:[%s3263_s24 + $0x38] sm:$0xff]  ;;  %s3071_s13 = smov [#allocation2]  }
  0x1a   : > { %2527 = vmatprep.subr.bf16.mxu1 %v2761_v14  ;;  %v367_v33 = vpack.c.bf16 %v346_v32, %v339_v31  ;;  %v338_v35 = vld [vmem:[%s3263_s24] sm:$0xff]  ;;  %v341_v39 = vld [vmem:[%s3263_s24 + $0x18] sm:$0xff]  ;;  %v348_v40 = vld [vmem:[%s3263_s24 + $0x50] sm:$0xff]  ;;  %s3715_s22 = scalar_lea.hbm %s3771_s9, %s2704_s26  ;;  %s3010_s27 = sshll.u32 %s3071_s13, 4  ;;  %s3011_s27 = int_to_ptr.vmem [resolvable:$false] %s3010_s27 }
  0x1b   : > { %2500 = vmatpush3.bf16.msra.mxu0 %v2760_v13  ;;  %v366_v37 = vpack.c.bf16 %v345_v36, %v338_v35  ;;  %v369_v41 = vpack.c.bf16 %v348_v40, %v341_v39  ;;  %v340_v43 = vld [vmem:[%s3263_s24 + $0x10] sm:$0xff]  ;;  %v347_v44 = vld [vmem:[%s3263_s24 + $0x48] sm:$0xff]  ;;  %v2785_v50 = vld [vmem:[%s3763_s1 + $0x158] sm:$0xff]   ;;  %s3012_s28 = scalar_lea.vmem %s3011_s27, 7168 }
  0x1c   : > { %2501 = vmatprep.subr.bf16.mxu0 %v2763_v16  ;;  %818 = vmatprep.mubr.bf16.mxu0 %v367_v33  ;;  %v368_v45 = vpack.c.bf16 %v347_v44, %v340_v43  ;;  %v2783_v48 = vld [vmem:[%s3763_s1 + $0x150] sm:$0xff]   ;;  %v2786_v51 = vld [vmem:[%s3763_s1 + $0x118] sm:$0xff]   ;;  %v2787_v54 = vld [vmem:[%s3763_s1 + $0x160] sm:$0xff]  }
  0x1d   : > { %2528 = vmatpush3.bf16.msra.mxu1 %v2762_v15  ;;  %867 = vmatprep.mubr.bf16.mxu1 %v369_v41  ;;  %v2784_v49 = vld [vmem:[%s3763_s1 + $0x110] sm:$0xff]   ;;  %v353_v52 = vld [vmem:[%s3263_s24 + $0x78] sm:$0xff]  ;;  %v359_v57 = vld [vmem:[%s3263_s24 + $0xa8] sm:$0xff] }
  0x1e   : > { %2529 = vmatprep.subr.bf16.mxu1 %v2765_v18  ;;  %v360_v53 = vld [vmem:[%s3263_s24 + $0xb0] sm:$0xff]  ;;  %v2788_v58 = vld [vmem:[%s3763_s1 + $0x120] sm:$0xff]   ;;  %v355_v60 = vld [vmem:[%s3263_s24 + $0x88] sm:$0xff] }
  0x1f   : > { %2502 = vmatpush3.bf16.msra.mxu0 %v2764_v17  ;;  %v374_v55 = vpack.c.bf16 %v360_v53, %v353_v52  ;;  %v352_v56 = vld [vmem:[%s3263_s24 + $0x70] sm:$0xff]  ;;  %v362_v61 = vld [vmem:[%s3263_s24 + $0xc0] sm:$0xff]  ;;  %v361_v0 = vld [vmem:[%s3263_s24 + $0xb8] sm:$0xff] }
  0x20   : > { %2503 = vmatprep.subr.bf16.mxu0 %v2767_v20  ;;  %v373_v59 = vpack.c.bf16 %v359_v57, %v352_v56  ;;  %v354_v62 = vld [vmem:[%s3263_s24 + $0x80] sm:$0xff]  ;;  %v376_v63 = vpack.c.bf16 %v362_v61, %v355_v60  ;;  %v2789_v1 = vld [vmem:[%s3763_s1 + $0x168] sm:$0xff]   ;;  %v2791_v5 = vld [vmem:[%s3763_s1 + $0x170] sm:$0xff]  }
  0x21   : > { %2530 = vmatpush3.bf16.msra.mxu1 %v2766_v19  ;;  %v375_v2 = vpack.c.bf16 %v361_v0, %v354_v62  ;;  %v2793_v3 = vld [vmem:[%s3763_s1 + $0x180] sm:$0xff]   ;;  %v2790_v4 = vld [vmem:[%s3763_s1 + $0x128] sm:$0xff]   ;;  %v344_v9 = vld [vmem:[%s3263_s24 + $0x30] sm:$0xff] }
  0x22   : > { %2531 = vmatprep.subr.bf16.mxu1 %v2769_v22  ;;  %v343_v6 = vld [vmem:[%s3263_s24 + $0x28] sm:$0xff]  ;;  %v350_v7 = vld [vmem:[%s3263_s24 + $0x60] sm:$0xff]  ;;  %v365_v12 = vld [vmem:[%s3263_s24 + $0xd8] sm:$0xff] }
  0x23   : > { %2504 = vmatpush3.bf16.msra.mxu0 %v2768_v21  ;;  %v371_v8 = vpack.c.bf16 %v350_v7, %v343_v6  ;;  %v351_v10 = vld [vmem:[%s3263_s24 + $0x68] sm:$0xff]  ;;  %v358_v11 = vld [vmem:[%s3263_s24 + $0xa0] sm:$0xff]  ;;  %v2792_v13 = vld [vmem:[%s3763_s1 + $0x130] sm:$0xff]  }
  0x24   : > { %2505 = vmatprep.subr.bf16.mxu0 %v2771_v24  ;;  %v372_v14 = vpack.c.bf16 %v351_v10, %v344_v9  ;;  %v379_v15 = vpack.c.bf16 %v365_v12, %v358_v11  ;;  %v2794_v16 = vld [vmem:[%s3763_s1 + $0x178] sm:$0xff]   ;;  %v342_v18 = vld [vmem:[%s3263_s24 + $0x20] sm:$0xff]  ;;  %v364_v21 = vld [vmem:[%s3263_s24 + $0xd0] sm:$0xff] }
  0x25   : > { %2532 = vmatpush3.bf16.msra.mxu1 %v2770_v23  ;;  %v2795_v17 = vld [vmem:[%s3763_s1 + $0x138] sm:$0xff]   ;;  %v356_v24 = vld [vmem:[%s3263_s24 + $0x90] sm:$0xff]  ;;  %v2800_v31 = vld [vmem:[%s3764_s2 + $0x20] sm:$0xff]  }
  0x26   : > { %2533 = vmatprep.subr.bf16.mxu1 %v2773_v26  ;;  %v349_v19 = vld [vmem:[%s3263_s24 + $0x58] sm:$0xff]  ;;  %v2801_v32 = vld [vmem:[%s3764_s2 + $0x28] sm:$0xff]   ;;  %v2802_v33 = vld [vmem:[%s3764_s2 + $0x30] sm:$0xff]  }
  0x27   : > { %2506 = vmatpush3.bf16.msra.mxu0 %v2772_v25  ;;  %v357_v20 = vld [vmem:[%s3263_s24 + $0x98] sm:$0xff]  ;;  %v370_v22 = vpack.c.bf16 %v349_v19, %v342_v18  ;;  %v363_v25 = vld [vmem:[%s3263_s24 + $0xc8] sm:$0xff]  ;;  %v2804_v35 = vld [vmem:[%s3765_s3] sm:$0xff]   ;;  %s326_s24 = sand.u32 1, %s3060_s10  }
  0x28   : > { %2507 = vmatprep.subr.bf16.mxu0 %v2775_v28  ;;  %v378_v23 = vpack.c.bf16 %v364_v21, %v357_v20  ;;  %v377_v26 = vpack.c.bf16 %v363_v25, %v356_v24  ;;  %v2797_v28 = vld [vmem:[%s3764_s2 + $0x8] sm:$0xff]   ;;  %s3655_s29 = smul.u32 224, %s326_s24  ;;  %s3721_s25 = scalar_lea.sflag [#allocation3], %s326_s24 }
  0x29   : > { %2534 = vmatpush3.bf16.msra.mxu1 %v2774_v27  ;;  %v2796_v27 = vld [vmem:[%s3764_s2] sm:$0xff]   ;;  %v2805_v36 = vld [vmem:[%s3765_s3 + $0x8] sm:$0xff]  }
  0x2a   : > { %2535 = vmatprep.subr.bf16.mxu1 %v2777_v30  ;;  %v2799_v30 = vld [vmem:[%s3764_s2 + $0x18] sm:$0xff]   ;;  %s3668_s14 = scalar_lea.vmem [#allocation2], %s3655_s29 }
  0x2b   : > { %2508 = vmatpush3.bf16.msra.mxu0 %v2776_v29  ;;  %v2798_v29 = vld [vmem:[%s3764_s2 + $0x10] sm:$0xff]   ;;  %s2281_s16 = sshll.u32 %s3668_s14, 4  ;;  %s3710_s16 = int_to_ptr.vmem [resolvable:$true] %s2281_s16 }
  0x2c   : > { %2549 = vmatprep.subr.bf16.mxu0 %v2779_v38  ;;  %v2349_v38 = vld [vmem:[%s3770_s8] ss:$0 sm:$0xff]  ;;  %s3006_s23 = scalar_lea.vmem %s3710_s16, 3584  ;;  %p3013_p0 = scmp.lt.s32.totalorder %s3710_s16, %s3011_s27 }
  0x2d   : > { %2536 = vmatpush3.bf16.msra.mxu1 %v2778_v34  ;;  %v2803_v34 = vld [vmem:[%s3764_s2 + $0x38] sm:$0xff]   ;;  %p3007_p11 = scmp.ne.s32.totalorder %s3710_s16, %s3006_s23  ;;  %p3014_p1 = scmp.lt.s32.totalorder %s3012_s28, %s3006_s23 }
  0x2e   : > { %819 = vmatmul.mubr.bf16.vlgmr.msra.gmra.mrb[0].mxu0 %v366_v37  ;;  %2618 = vmatprep.subr.bf16.mxu1 %v2793_v3 }
  0x2f   : > { %2550 = vmatpush3.bf16.msra.mxu0 %v2780_v42  ;;  %826 = vmatprep.mubr.bf16.mxu0 %v374_v55  ;;  %p3008_p12 = pnand %p3007_p11, %p3162_p5  ;;  %p3015_p2 = por %p3014_p1, %p3013_p0 }
  0x30   : > { %868 = vmatmul.mubr.bf16.vlgmr.msra.gmra.mrb[0].mxu1 %v368_v45  ;;  %2551 = vmatprep.subr.bf16.mxu0 %v2781_v46 }
  0x31   : > { %875 = vmatprep.mubr.bf16.mxu1 %v376_v63  ;;  %2619 = vmatpush3.bf16.msra.mxu1 %v2793_v3  ;;  %p3009_p13 = pneg %p3008_p12 }
  0x32   : > { %2624 = vmatprep.subr.bf16.mxu1 %v2796_v27 }
  0x33   : > { %2552 = vmatpush3.bf16.msra.mxu0 %v2782_v47  ;;  %p3016_p3 = pnand %p3015_p2, %p3009_p13 }
  0x34   : > { %2553 = vmatprep.subr.bf16.mxu0 %v2783_v48 }
  0x36   : > { %827 = vmatmul.mubr.bf16.gmra.mrb[4].mxu0 %v373_v59 }
  0x37   : > { %2554 = vmatpush3.bf16.msra.mxu0 %v2784_v49  ;;  %916 = vmatprep.mubr.bf16.mxu0 %v371_v8 }
  0x38   : > { %2555 = vmatprep.subr.bf16.mxu0 %v2785_v50  ;;  %876 = vmatmul.mubr.bf16.gmra.mrb[4].mxu1 %v375_v2 }
  0x39   : > { %2620 = vmatprep.mubr.msk.bf16.mxu1 %vm779_vm0, %v372_v14 }
  0x3b   : > { %2556 = vmatpush3.bf16.msra.mxu0 %v2786_v51 }
  0x3c   : > { %2557 = vmatprep.subr.bf16.mxu0 %v2787_v54 }
  0x3f   : > { %2558 = vmatpush3.bf16.msra.mxu0 %v2788_v58 }
  0x40   : > { %2559 = vmatprep.subr.bf16.mxu0 %v2789_v1  ;;  %2621 = vmatmul.mubr.msk.bf16.vlgmr.msra.gmra.mrb[8].mxu1 %vm779_vm0, %v379_v15 }
  0x41   : > { %2625 = vmatpush3.bf16.msra.mxu1 %v2796_v27 }
  0x42   : > { %2626 = vmatprep.subr.bf16.mxu1 %v2797_v28 }
  0x43   : > { %2560 = vmatpush3.bf16.msra.mxu0 %v2790_v4 }
  0x44   : > { %2561 = vmatprep.subr.bf16.mxu0 %v2791_v5 }
  0x45   : > { %2627 = vmatpush3.bf16.msra.mxu1 %v2797_v28 }
  0x46   : > { %2628 = vmatprep.subr.bf16.mxu1 %v2798_v29 }
  0x47   : > { %2562 = vmatpush3.bf16.msra.mxu0 %v2792_v13 }
  0x48   : > { %2563 = vmatprep.subr.bf16.mxu0 %v2794_v16 }
  0x49   : > { %2629 = vmatpush3.bf16.msra.mxu1 %v2798_v29 }
  0x4a   : > { %2630 = vmatprep.subr.bf16.mxu1 %v2799_v30 }
  0x4b   : > { %2564 = vmatpush3.bf16.msra.mxu0 %v2795_v17 }
  0x4c   : > { %2644 = vmatprep.subr.bf16.mxu0 %v2804_v35 }
  0x4d   : > { %2631 = vmatpush3.bf16.msra.mxu1 %v2799_v30 }
  0x4e   : > { %917 = vmatmul.mubr.bf16.vlgmr.msra.gmra.mrb[8].mxu0 %v370_v22  ;;  %2632 = vmatprep.subr.bf16.mxu1 %v2800_v31 }
  0x4f   : > { %924 = vmatprep.mubr.bf16.mxu0 %v378_v23  ;;  %2645 = vmatpush3.bf16.msra.mxu0 %v2804_v35 }
  0x50   : > { %2646 = vmatprep.subr.bf16.mxu0 %v2805_v36 }
  0x51   : > { %2633 = vmatpush3.bf16.msra.mxu1 %v2800_v31 }
  0x52   : > { %2634 = vmatprep.subr.bf16.mxu1 %v2801_v32 }
  0x53   : > { %2647 = vmatpush3.bf16.msra.mxu0 %v2805_v36  ;;  %v2806_v36 = vld [vmem:[%s3765_s3 + $0x10] sm:$0xff]  }
  0x54   : > { %2648 = vmatprep.subr.bf16.mxu0 %v2806_v36 }
  0x55   : > { %2635 = vmatpush3.bf16.msra.mxu1 %v2801_v32 }
  0x56   : > { %925 = vmatmul.mubr.bf16.gmra.mrb[12].mxu0 %v377_v26  ;;  %2636 = vmatprep.subr.bf16.mxu1 %v2802_v33 }
  0x57   : > { %2649 = vmatpush3.bf16.msra.mxu0 %v2806_v36  ;;  %v2840_v36 = vld [vmem:[%s3769_s7 + $0xe4] ss:$28 sps:$4 sm:$0xff]  }
  0x59   : > { %2637 = vmatpush3.bf16.msra.mxu1 %v2802_v33 }
  0x5a   : > { %2638 = vmatprep.subr.bf16.mxu1 %v2803_v34 }
  0x5d   : > { %2639 = vmatpush3.bf16.msra.mxu1 %v2803_v34 }
 0x101   : > { %v2509_v37 = vpop.f32.mrb[0].mxu0 }
 0x102   : > { %v2510_v39 = vpop.f32.mrb[1].mxu0 }
 0x103   : > { %v2511_v40 = vadd.f32 %v2510_v39, %v2509_v37  ;;  %v2512_v41 = vpop.f32.mrb[2].mxu0  ;;  %v2537_v42 = vpop.f32.mrb[0].mxu1  ;;  %v2807_v37 = vld [vmem:[%s3765_s3 + $0x18] sm:$0xff]  }
 0x104   : > { %v2513_v43 = vpop.f32.mrb[3].mxu0  ;;  %v2538_v46 = vpop.f32.mrb[1].mxu1  ;;  %2650 = vmatprep.subr.bf16.mxu0 %v2807_v37 }
 0x105   : > { %v821_v44 = vadd.f32 %v2511_v40, %v2349_v38  ;;  %v2514_v45 = vadd.f32 %v2513_v43, %v2512_v41  ;;  %v2539_v47 = vadd.f32 %v2538_v46, %v2537_v42  ;;  %v2540_v48 = vpop.f32.mrb[2].mxu1  ;;  %2651 = vmatpush3.bf16.msra.mxu0 %v2807_v37  ;;  %v2838_v37 = vld [vmem:[%s3769_s7 + $0xe0] ss:$28 sps:$4 sm:$0xff]  }
 0x106   : > { %v2541_v50 = vpop.f32.mrb[3].mxu1 }
 0x107   : > { %v824_v49 = vadd.f32 %v2514_v45, %v2349_v38  ;;  %v870_v51 = vadd.f32 %v2539_v47, %v821_v44  ;;  %v2542_v52 = vadd.f32 %v2541_v50, %v2540_v48 }
 0x109   : > { %v873_v53 = vadd.f32 %v2542_v52, %v824_v49  ;;  %v2515_v54 = vpop.f32.mrb[4].mxu0 }
 0x10a   : > { %v2516_v55 = vpop.f32.mrb[5].mxu0 }
 0x10b   : > { %v2517_v56 = vadd.f32 %v2516_v55, %v2515_v54  ;;  %v2518_v57 = vpop.f32.mrb[6].mxu0  ;;  %v2543_v58 = vpop.f32.mrb[4].mxu1  ;;  %v2410_v55 = vld [vmem:[%s3770_s8 + $0x2] ss:$0 sm:$0xff] }
 0x10c   : > { %v2519_v59 = vpop.f32.mrb[7].mxu0  ;;  %v2544_v60 = vpop.f32.mrb[5].mxu1 }
 0x10d   : > { %v829_v61 = vadd.f32 %v2517_v56, %v2349_v38  ;;  %v2520_v62 = vadd.f32 %v2519_v59, %v2518_v57  ;;  %v2545_v63 = vadd.f32 %v2544_v60, %v2543_v58  ;;  %v2546_v0 = vpop.f32.mrb[6].mxu1 }
 0x10e   : > { %v2547_v1 = vpop.f32.mrb[7].mxu1 }
 0x10f   : > { %v832_v2 = vadd.f32 %v2520_v62, %v2349_v38  ;;  %v878_v3 = vadd.f32 %v2545_v63, %v829_v61  ;;  %v2548_v4 = vadd.f32 %v2547_v1, %v2546_v0  ;;  %v2401_v38 = vld [vmem:[%s3770_s8 + $0x1] ss:$0 sm:$0xff] }
 0x111   : > { %v881_v5 = vadd.f32 %v2548_v4, %v832_v2 }
 0x113   : > { %v2622_v6 = vpop.f32.mrb[8].mxu1 }
 0x114   : > { %v967_v7 = vpop.f32.mrb[9].mxu1 }
 0x115   : > { %v2623_v8 = vpop.f32.mrb[10].mxu1 }
 0x116   : > { %v970_v9 = vpop.f32.mrb[11].mxu1 }
 0x121   : > { %v2565_v10 = vpop.f32.mrb[8].mxu0 }
 0x122   : > { %v2566_v11 = vpop.f32.mrb[9].mxu0 }
 0x123   : > { %v2567_v12 = vadd.f32 %v2566_v11, %v2565_v10  ;;  %v2568_v13 = vpop.f32.mrb[10].mxu0  ;;  %v2417_v10 = vld [vmem:[%s3770_s8 + $0x3] ss:$0 sm:$0xff] }
 0x124   : > { %v2569_v14 = vpop.f32.mrb[11].mxu0 }
 0x125   : > { %v2570_v15 = vadd.f32 %v2569_v14, %v2568_v13  ;;  %v919_v16 = vadd.f32 %v2567_v12, %v870_v51 }
 0x127   : > { %v968_v17 = vadd.f32 %v967_v7, %v919_v16  ;;  %v922_v18 = vadd.f32 %v2570_v15, %v873_v53  ;;  %v2808_v53 = vld [vmem:[%s3766_s4] sm:$0x3f]  }
 0x128   : > { %2700 = vmatprep.subr.msk.bf16.mxu0 %vm1236_vm2, %v2808_v53  ;;  %v1238_v54 = vsel %vm1236_vm2, %v2808_v53, 0 }
 0x129   : > { %v971_v19 = vadd.f32 %v970_v9, %v922_v18  ;;  %v2571_v20 = vpop.f32.mrb[12].mxu0  ;;  %v982_v22 = vmax.f32 %v968_v17, 0.0  ;;  %v2811_v9 = vld [vmem:[%s3768_s6 + $0x8] sm:$0xff]  }
 0x12a   : > { %v2572_v21 = vpop.f32.mrb[13].mxu0 }
 0x12b   : > { %v983_v23 = vmax.f32 %v971_v19, 0.0  ;;  %v2573_v24 = vadd.f32 %v2572_v21, %v2571_v20  ;;  %v2574_v25 = vpop.f32.mrb[14].mxu0 }
 0x12c   : > { %v2575_v26 = vpop.f32.mrb[15].mxu0 }
 0x12d   : > { %v986_v27 = vpack.c.bf16 %v983_v23, %v982_v22  ;;  %v927_v28 = vadd.f32 %v2573_v24, %v878_v3  ;;  %v2576_v29 = vadd.f32 %v2575_v26, %v2574_v25  ;;  %v2812_v25 = vld [vmem:[%s3768_s6 + $0x10] sm:$0xff]   ;;  %v2813_v26 = vld [vmem:[%s3768_s6 + $0x18] sm:$0xff]  }
 0x12f   : > { %v976_v30 = vadd.f32 %v2622_v6, %v927_v28  ;;  %v930_v31 = vadd.f32 %v2576_v29, %v881_v5  ;;  %2640 = vmatprep.mubr.bf16.mxu1 %v986_v27  ;;  %v2809_v6 = vld [vmem:[%s3767_s5] sm:$0x3f]   ;;  %v2819_v29 = vld [vmem:[%s3769_s7 + $0xc] ss:$28 sps:$4 sm:$0xff]  }
 0x130   : > { %2701 = vmatprep.subr.msk.bf16.mxu1 %vm1236_vm2, %v2809_v6  ;;  %v1316_v7 = vsel %vm1236_vm2, %v2809_v6, 0  ;;  %v2814_v27 = vld [vmem:[%s3769_s7] ss:$28 sps:$4 sm:$0xff]   ;;  %v2858_v6 = vld [vmem:[%s3769_s7 + $0x18c] ss:$28 sps:$4 sm:$0xff]  }
 0x131   : > { %v979_v32 = vadd.f32 %v2623_v8, %v930_v31  ;;  %v984_v33 = vmax.f32 %v976_v30, 0.0  ;;  %v2810_v8 = vld [vmem:[%s3768_s6] sm:$0xff]   ;;  %v2822_v30 = vld [vmem:[%s3769_s7 + $0x3c] ss:$28 sps:$4 sm:$0xff]  }
 0x132   : > { %v2816_v28 = vld [vmem:[%s3769_s7 + $0x4] ss:$28 sps:$4 sm:$0xff]   ;;  %v2820_v31 = vld [vmem:[%s3769_s7 + $0x38] ss:$28 sps:$4 sm:$0xff]  }
 0x133   : > { %v985_v34 = vmax.f32 %v979_v32, 0.0  ;;  %v2828_v32 = vld [vmem:[%s3769_s7 + $0x74] ss:$28 sps:$4 sm:$0xff]  }
 0x135   : > { %v987_v35 = vpack.c.bf16 %v985_v34, %v984_v33  ;;  %v2826_v33 = vld [vmem:[%s3769_s7 + $0x70] ss:$28 sps:$4 sm:$0xff]  }
 0x136   : > { %v2834_v34 = vld [vmem:[%s3769_s7 + $0xac] ss:$28 sps:$4 sm:$0xff]  }
 0x137   : > { %2641 = vmatmul.mubr.bf16.vlgmr.msra.gmra.mrb[12].mxu1 %v987_v35  ;;  %v2832_v35 = vld [vmem:[%s3769_s7 + $0xa8] ss:$28 sps:$4 sm:$0xff]  }
 0x138   : > { %2663 = vmatpush3.bf16.msra.mxu1 %v1316_v7  ;;  %v2861_v7 = vld [vmem:[%s3769_s7 + $0x194] ss:$28 sps:$4 sm:$0xff]  }
 0x139   : > { %1862 = vmatprep.subr.bf16.mxu1 %v2816_v28 }
 0x20a   : > { %v2642_v39 = vpop.f32.mrb[12].mxu1 }
 0x20b   : > { %v1102_v40 = vadd.f32 %v2642_v39, %v2401_v38  ;;  %v1093_v41 = vpop.f32.mrb[13].mxu1  ;;  %v2844_v39 = vld [vmem:[%s3769_s7 + $0x118] ss:$28 sps:$4 sm:$0xff]  }
 0x20c   : > { %v1094_v42 = vadd.f32 %v2401_v38, %v1093_v41  ;;  %v2643_v43 = vpop.f32.mrb[14].mxu1 }
 0x20d   : > { %v1105_v44 = vadd.f32 %v2643_v43, %v2401_v38  ;;  %v1096_v45 = vpop.f32.mrb[15].mxu1  ;;  %v1110_v47 = vmax.f32 %v1102_v40, 0.0  ;;  %v2421_v40 = vld [vmem:[%s3770_s8 + $0x4] ss:$0 sm:$0xff] }
 0x20e   : > { %v1097_v46 = vadd.f32 %v2401_v38, %v1096_v45  ;;  %v1108_v49 = vmax.f32 %v1094_v42, 0.0  ;;  %v2846_v38 = vld [vmem:[%s3769_s7 + $0x11c] ss:$28 sps:$4 sm:$0xff]  }
 0x20f   : > { %v1111_v48 = vmax.f32 %v1105_v44, 0.0 }
 0x210   : > { %v1109_v50 = vmax.f32 %v1097_v46, 0.0 }
 0x211   : > { %v1113_v51 = vpack.c.bf16 %v1111_v48, %v1110_v47 }
 0x212   : > { %v1112_v52 = vpack.c.bf16 %v1109_v50, %v1108_v49 }
 0x214   : > { %2652 = vmatprep.mubr.msk.bf16.mxu0 %vm1153_vm1, %v1112_v52 }
 0x215   : > { %2653 = vmatmul.mubr.msk.bf16.vlgmr.msra.gmra.mrb[16].mxu0 %vm1153_vm1, %v1113_v51 }
 0x216   : > { %2657 = vmatpush3.bf16.msra.mxu0 %v1238_v54 }
 0x217   : > { %2668 = vmatprep.subr.bf16.mxu0 %v2810_v8 }
 0x2e8   : > { %v2654_v56 = vpop.f32.mrb[16].mxu0 }
 0x2e9   : > { %v1203_v57 = vadd.f32 %v2654_v56, %v2410_v55  ;;  %v1194_v58 = vpop.f32.mrb[17].mxu0  ;;  %v2825_v56 = vld [vmem:[%s3769_s7 + $0x44] ss:$28 sps:$4 sm:$0xff]  }
 0x2ea   : > { %v1195_v59 = vadd.f32 %v2410_v55, %v1194_v58  ;;  %v2655_v60 = vpop.f32.mrb[18].mxu0  ;;  %v2831_v58 = vld [vmem:[%s3769_s7 + $0x7c] ss:$28 sps:$4 sm:$0xff]  }
 0x2eb   : > { %v1206_v61 = vadd.f32 %v2655_v60, %v2410_v55  ;;  %v1197_v62 = vpop.f32.mrb[19].mxu0  ;;  %v1211_v0 = vmax.f32 %v1203_v57, 0.0  ;;  %v2823_v57 = vld [vmem:[%s3769_s7 + $0x40] ss:$28 sps:$4 sm:$0xff]   ;;  %v2837_v60 = vld [vmem:[%s3769_s7 + $0xb4] ss:$28 sps:$4 sm:$0xff]  }
 0x2ec   : > { %v1198_v63 = vadd.f32 %v2410_v55, %v1197_v62  ;;  %v1209_v2 = vmax.f32 %v1195_v59, 0.0  ;;  %v2817_v55 = vld [vmem:[%s3769_s7 + $0x8] ss:$28 sps:$4 sm:$0xff]   ;;  %v2829_v59 = vld [vmem:[%s3769_s7 + $0x78] ss:$28 sps:$4 sm:$0xff]  }
 0x2ed   : > { %v1212_v1 = vmax.f32 %v1206_v61, 0.0  ;;  %v2835_v61 = vld [vmem:[%s3769_s7 + $0xb0] ss:$28 sps:$4 sm:$0xff]  }
 0x2ee   : > { %v1210_v3 = vmax.f32 %v1198_v63, 0.0  ;;  %v2843_v62 = vld [vmem:[%s3769_s7 + $0xec] ss:$28 sps:$4 sm:$0xff]  }
 0x2ef   : > { %v1214_v4 = vpack.c.bf16 %v1212_v1, %v1211_v0  ;;  %v2841_v63 = vld [vmem:[%s3769_s7 + $0xe8] ss:$28 sps:$4 sm:$0xff]   ;;  %v2847_v1 = vld [vmem:[%s3769_s7 + $0x120] ss:$28 sps:$4 sm:$0xff]  }
 0x2f0   : > { %v1213_v5 = vpack.c.bf16 %v1210_v3, %v1209_v2  ;;  %v2849_v0 = vld [vmem:[%s3769_s7 + $0x124] ss:$28 sps:$4 sm:$0xff]   ;;  %v2852_v2 = vld [vmem:[%s3769_s7 + $0x154] ss:$28 sps:$4 sm:$0xff]   ;;  %v2855_v3 = vld [vmem:[%s3769_s7 + $0x15c] ss:$28 sps:$4 sm:$0xff]  }
 0x2f2   : > { %2658 = vmatprep.mubr.msk.bf16.mxu0 %vm1229_vm3, %v1213_v5  ;;  %v2853_v5 = vld [vmem:[%s3769_s7 + $0x158] ss:$28 sps:$4 sm:$0xff]  }
 0x2f3   : > { %2659 = vmatmul.mubr.msk.bf16.vlgmr.msra.gmra.mrb[20].mxu0 %vm1229_vm3, %v1214_v4  ;;  %v2850_v4 = vld [vmem:[%s3769_s7 + $0x150] ss:$28 sps:$4 sm:$0xff]  }
 0x2f4   : > { %2669 = vmatpush3.bf16.msra.mxu0 %v2810_v8  ;;  %v2856_v8 = vld [vmem:[%s3769_s7 + $0x188] ss:$28 sps:$4 sm:$0xff]  }
 0x2f5   : > { %2670 = vmatprep.subr.bf16.mxu0 %v2811_v9 }
 0x2f8   : > { %2671 = vmatpush3.bf16.msra.mxu0 %v2811_v9  ;;  %v2859_v9 = vld [vmem:[%s3769_s7 + $0x190] ss:$28 sps:$4 sm:$0xff]  }
 0x2f9   : > { %2672 = vmatprep.subr.bf16.mxu0 %v2812_v25 }
 0x2fc   : > { %2673 = vmatpush3.bf16.msra.mxu0 %v2812_v25 }
 0x2fd   : > { %2674 = vmatprep.subr.bf16.mxu0 %v2813_v26 }
 0x300   : > { %2675 = vmatpush3.bf16.msra.mxu0 %v2813_v26 }
 0x301   : > { %1915 = vmatprep.subr.bf16.mxu0 %v2819_v29  ;;  %v2868_v29 = vld [vmem:[%s3769_s7 + $0x4c] ss:$28 sps:$4 sm:$0xff]  }
 0x3c6   : > { %v2660_v11 = vpop.f32.mrb[20].mxu0 }
 0x3c7   : > { %v1283_v12 = vadd.f32 %v2660_v11, %v2417_v10  ;;  %v1274_v13 = vpop.f32.mrb[21].mxu0  ;;  %v3070_v11 = vmov 0  }
 0x3c8   : > { %v1275_v14 = vadd.f32 %v2417_v10, %v1274_v13  ;;  %v2661_v15 = vpop.f32.mrb[22].mxu0  ;;  %v2425_v13 = vld [vmem:[%s3770_s8 + $0x5] ss:$0 sm:$0xff] }
 0x3c9   : > { %v1286_v16 = vadd.f32 %v2661_v15, %v2417_v10  ;;  %v1277_v17 = vpop.f32.mrb[23].mxu0  ;;  %v1291_v19 = vmax.f32 %v1283_v12, 0.0  ;;  %v2865_v12 = vld [vmem:[%s3769_s7 + $0x18] ss:$28 sps:$4 sm:$0xff]  }
 0x3ca   : > { %v1278_v18 = vadd.f32 %v2417_v10, %v1277_v17  ;;  %v1289_v21 = vmax.f32 %v1275_v14, 0.0  ;;  %v2864_v10 = vld [vmem:[%s3769_s7 + $0x14] ss:$28 sps:$4 sm:$0xff]  }
 0x3cb   : > { %v1292_v20 = vmax.f32 %v1286_v16, 0.0 }
 0x3cc   : > { %v1290_v22 = vmax.f32 %v1278_v18, 0.0 }
 0x3cd   : > { %v1294_v23 = vpack.c.bf16 %v1292_v20, %v1291_v19 }
 0x3ce   : > { %v1293_v24 = vpack.c.bf16 %v1290_v22, %v1289_v21 }
 0x3d0   : > { %2664 = vmatprep.mubr.msk.bf16.mxu1 %vm1229_vm3, %v1293_v24 }
 0x3d1   : > { %2665 = vmatmul.mubr.msk.bf16.vlgmr.msra.gmra.mrb[16].mxu1 %vm1229_vm3, %v1294_v23 }
 0x3d2   : > { %1863 = vmatpush1.bf16.msra.mxu1 %v2814_v27  ;;  %1894 = vmatprep.mubr.bf16.mxu1 %v3070_v11  ;;  %v2862_v27 = vld [vmem:[%s3769_s7 + $0x10] ss:$28 sps:$4 sm:$0xff]  }
 0x3d3   : > { %1864 = vmatprep.subr.bf16.mxu1 %v2822_v30  ;;  %v2869_v30 = vld [vmem:[%s3769_s7 + $0x50] ss:$28 sps:$4 sm:$0xff]  }
 0x3d6   : > { %1865 = vmatpush1.bf16.msra.mxu1 %v2820_v31  ;;  %v2866_v31 = vld [vmem:[%s3769_s7 + $0x48] ss:$28 sps:$4 sm:$0xff]  }
 0x3d7   : > { %1866 = vmatprep.subr.bf16.mxu1 %v2828_v32  ;;  %v2872_v32 = vld [vmem:[%s3769_s7 + $0x84] ss:$28 sps:$4 sm:$0xff]  }
 0x3da   : > { %1867 = vmatpush1.bf16.msra.mxu1 %v2826_v33  ;;  %v2873_v33 = vld [vmem:[%s3769_s7 + $0x88] ss:$28 sps:$4 sm:$0xff]  }
 0x3db   : > { %1868 = vmatprep.subr.bf16.mxu1 %v2834_v34  ;;  %v2870_v34 = vld [vmem:[%s3769_s7 + $0x80] ss:$28 sps:$4 sm:$0xff]  }
 0x3de   : > { %1869 = vmatpush1.bf16.msra.mxu1 %v2832_v35  ;;  %v2876_v35 = vld [vmem:[%s3769_s7 + $0xbc] ss:$28 sps:$4 sm:$0xff]  }
 0x3df   : > { %1870 = vmatprep.subr.bf16.mxu1 %v2840_v36  ;;  %v2877_v36 = vld [vmem:[%s3769_s7 + $0xc0] ss:$28 sps:$4 sm:$0xff]  }
 0x3e2   : > { %1871 = vmatpush1.bf16.msra.mxu1 %v2838_v37  ;;  %v2874_v37 = vld [vmem:[%s3769_s7 + $0xb8] ss:$28 sps:$4 sm:$0xff]  }
 0x3e3   : > { %1872 = vmatprep.subr.bf16.mxu1 %v2846_v38  ;;  %v2880_v38 = vld [vmem:[%s3769_s7 + $0xf4] ss:$28 sps:$4 sm:$0xff]  }
 0x3e6   : > { %1873 = vmatpush1.bf16.msra.mxu1 %v2844_v39  ;;  %v2881_v39 = vld [vmem:[%s3769_s7 + $0xf8] ss:$28 sps:$4 sm:$0xff]  }
 0x3e7   : > { %1874 = vmatprep.subr.bf16.mxu1 %v2852_v2 }
 0x3ea   : > { %1875 = vmatpush1.bf16.msra.mxu1 %v2850_v4 }
 0x3eb   : > { %1876 = vmatprep.subr.bf16.mxu1 %v2858_v6 }
 0x3ee   : > { %1877 = vmatpush1.bf16.msra.mxu1 %v2856_v8 }
 0x3ef   : > { %1968 = vmatprep.subr.bf16.mxu1 %v2864_v10 }
 0x4a4   : > { %v2666_v41 = vpop.f32.mrb[16].mxu1 }
 0x4a5   : > { %v1361_v42 = vadd.f32 %v2666_v41, %v2421_v40  ;;  %v1352_v43 = vpop.f32.mrb[17].mxu1  ;;  %v2884_v41 = vld [vmem:[%s3769_s7 + $0x12c] ss:$28 sps:$4 sm:$0xff]  }
 0x4a6   : > { %v1353_v44 = vadd.f32 %v2421_v40, %v1352_v43  ;;  %v2667_v45 = vpop.f32.mrb[18].mxu1  ;;  %v2882_v43 = vld [vmem:[%s3769_s7 + $0x128] ss:$28 sps:$4 sm:$0xff]  }
 0x4a7   : > { %v1364_v46 = vadd.f32 %v2667_v45, %v2421_v40  ;;  %v1355_v47 = vpop.f32.mrb[19].mxu1  ;;  %v1369_v49 = vmax.f32 %v1361_v42, 0.0  ;;  %v2885_v42 = vld [vmem:[%s3769_s7 + $0x130] ss:$28 sps:$4 sm:$0xff]   ;;  %v2889_v45 = vld [vmem:[%s3769_s7 + $0x168] ss:$28 sps:$4 sm:$0xff]  }
 0x4a8   : > { %v1356_v48 = vadd.f32 %v2421_v40, %v1355_v47  ;;  %v1367_v51 = vmax.f32 %v1353_v44, 0.0  ;;  %v2878_v40 = vld [vmem:[%s3769_s7 + $0xf0] ss:$28 sps:$4 sm:$0xff]   ;;  %v2888_v44 = vld [vmem:[%s3769_s7 + $0x164] ss:$28 sps:$4 sm:$0xff]  }
 0x4a9   : > { %v1370_v50 = vmax.f32 %v1364_v46, 0.0  ;;  %v2886_v46 = vld [vmem:[%s3769_s7 + $0x160] ss:$28 sps:$4 sm:$0xff]  }
 0x4aa   : > { %v1368_v52 = vmax.f32 %v1356_v48, 0.0  ;;  %v2892_v47 = vld [vmem:[%s3769_s7 + $0x19c] ss:$28 sps:$4 sm:$0xff]  }
 0x4ab   : > { %v1372_v53 = vpack.c.bf16 %v1370_v50, %v1369_v49  ;;  %v2893_v48 = vld [vmem:[%s3769_s7 + $0x1a0] ss:$28 sps:$4 sm:$0xff]   ;;  %v2890_v49 = vld [vmem:[%s3769_s7 + $0x198] ss:$28 sps:$4 sm:$0xff]   ;;  %v1539_v50 = vlaneseq }
 0x4ac   : > { %v1371_v54 = vpack.c.bf16 %v1368_v52, %v1367_v51 }
 0x4ad   : > { %v3619_v51 = vshrl.u32 %v1539_v50, 7 }
 0x4ae   : > { %2676 = vmatprep.mubr.msk.bf16.mxu0 %vm1153_vm1, %v1371_v54  ;;  %v3626_v54 = vld [vmem:[%s3770_s8 + $0x6] sm:$0x7f] }
 0x4af   : > { %2677 = vmatmul.mubr.msk.bf16.vlgmr.msra.gmra.mrb[24].mxu0 %vm1153_vm1, %v1372_v53  ;;  %v1541_v52 = vsub.s32 0, %v3619_v51  ;;  %v1549_v53 = vsub.s32 2, %v3619_v51 }
 0x4b0   : > { %1916 = vmatpush1.bf16.msra.mxu0 %v2817_v55  ;;  %1947 = vmatprep.mubr.bf16.mxu0 %v3070_v11  ;;  %v1545_v55 = vsub.s32 1, %v3619_v51 }
 0x4b1   : > { %1917 = vmatprep.subr.bf16.mxu0 %v2825_v56  ;;  %v1553_v56 = vsub.s32 3, %v3619_v51 }
 0x4b4   : > { %1918 = vmatpush1.bf16.msra.mxu0 %v2823_v57  ;;  %v1542_v57 = vrot.slane %v3626_v54, %v1541_v52 }
 0x4b5   : > { %1919 = vmatprep.subr.bf16.mxu0 %v2831_v58  ;;  %v3632_v58 = vrot.slane %v3626_v54, %v1549_v53 }
 0x4b8   : > { %1920 = vmatpush1.bf16.msra.mxu0 %v2829_v59  ;;  %v3635_v59 = vrot.slane %v3626_v54, %v1545_v55 }
 0x4b9   : > { %1921 = vmatprep.subr.bf16.mxu0 %v2837_v60  ;;  %v3638_v60 = vrot.slane %v3626_v54, %v1553_v56 }
 0x4bc   : > { %1922 = vmatpush1.bf16.msra.mxu0 %v2835_v61 }
 0x4bd   : > { %1923 = vmatprep.subr.bf16.mxu0 %v2843_v62 }
 0x4c0   : > { %1924 = vmatpush1.bf16.msra.mxu0 %v2841_v63 }
 0x4c1   : > { %1925 = vmatprep.subr.bf16.mxu0 %v2849_v0 }
 0x4c4   : > { %1926 = vmatpush1.bf16.msra.mxu0 %v2847_v1 }
 0x4c5   : > { %1927 = vmatprep.subr.bf16.mxu0 %v2855_v3 }
 0x4c8   : > { %1928 = vmatpush1.bf16.msra.mxu0 %v2853_v5 }
 0x4c9   : > { %1929 = vmatprep.subr.bf16.mxu0 %v2861_v7 }
 0x4cc   : > { %1930 = vmatpush1.bf16.msra.mxu0 %v2859_v9 }
 0x4cd   : > { %2680 = vmatprep.subr.bf16.mxu0 %v2865_v12 }
 0x582   : > { %v2678_v14 = vpop.f32.mrb[24].mxu0 }
 0x583   : > { %v1461_v15 = vadd.f32 %v2678_v14, %v2425_v13  ;;  %v1452_v16 = vpop.f32.mrb[25].mxu0 }
 0x584   : > { %v1453_v17 = vadd.f32 %v2425_v13, %v1452_v16  ;;  %v2679_v18 = vpop.f32.mrb[26].mxu0 }
 0x585   : > { %v1464_v19 = vadd.f32 %v2679_v18, %v2425_v13  ;;  %v1455_v20 = vpop.f32.mrb[27].mxu0  ;;  %v1469_v22 = vmax.f32 %v1461_v15, 0.0 }
 0x586   : > { %v1456_v21 = vadd.f32 %v2425_v13, %v1455_v20  ;;  %v1467_v24 = vmax.f32 %v1453_v17, 0.0 }
 0x587   : > { %v1470_v23 = vmax.f32 %v1464_v19, 0.0 }
 0x588   : > { %v1468_v25 = vmax.f32 %v1456_v21, 0.0 }
 0x589   : > { %v3543_v26 = vpack.c.bf16 %v1470_v23, %v1469_v22 }
 0x58a   : > { %v1471_v28 = vpack.c.bf16 %v1468_v25, %v1467_v24 }
 0x58c   : > { %1895 = vmatmul.mubr.bf16.vlgmr.msra.gmra.mrb[20].mxu1 %v1471_v28  ;;  %1948 = vmatmul.mubr.bf16.vlgmr.msra.gmra.mrb[28].mxu0 %v1471_v28 }
 0x58d   : > { %1969 = vmatpush1.bf16.msra.mxu1 %v2862_v27  ;;  %2681 = vmatpush3.bf16.msra.mxu0 %v2865_v12 }
 0x58e   : > { %1970 = vmatprep.subr.bf16.mxu1 %v2868_v29  ;;  %2682 = vmatprep.subr.bf16.mxu0 %v2869_v30 }
 0x58f   : > { %1904 = vmatprep.mubr.bf16.mxu1 %v3070_v11  ;;  %1957 = vmatprep.mubr.bf16.mxu0 %v3070_v11 }
 0x591   : > { %1971 = vmatpush1.bf16.msra.mxu1 %v2866_v31  ;;  %2683 = vmatpush3.bf16.msra.mxu0 %v2869_v30 }
 0x592   : > { %1972 = vmatprep.subr.bf16.mxu1 %v2872_v32  ;;  %2684 = vmatprep.subr.bf16.mxu0 %v2873_v33 }
 0x594   : > { %1905 = vmatmul.mubr.bf16.gmra.mrb[24].mxu1 %v3543_v26  ;;  %1958 = vmatmul.mubr.bf16.gmra.mrb[32].mxu0 %v3543_v26 }
 0x595   : > { %1973 = vmatpush1.bf16.msra.mxu1 %v2870_v34  ;;  %2685 = vmatpush3.bf16.msra.mxu0 %v2873_v33 }
 0x596   : > { %2696 = vmatprep.mubr.bf16.mxu0 %v1471_v28  ;;  %1974 = vmatprep.subr.bf16.mxu1 %v2876_v35 }
 0x597   : > { %2686 = vmatprep.subr.bf16.mxu0 %v2877_v36  ;;  %2000 = vmatprep.mubr.bf16.mxu1 %v3070_v11 }
 0x599   : > { %1975 = vmatpush1.bf16.msra.mxu1 %v2874_v37  ;;  %2687 = vmatpush3.bf16.msra.mxu0 %v2877_v36 }
 0x59a   : > { %1976 = vmatprep.subr.bf16.mxu1 %v2880_v38  ;;  %2688 = vmatprep.subr.bf16.mxu0 %v2881_v39 }
 0x59d   : > { %1977 = vmatpush1.bf16.msra.mxu1 %v2878_v40  ;;  %2689 = vmatpush3.bf16.msra.mxu0 %v2881_v39 }
 0x59e   : > { %1978 = vmatprep.subr.bf16.mxu1 %v2884_v41  ;;  %2690 = vmatprep.subr.bf16.mxu0 %v2885_v42 }
 0x5a1   : > { %1979 = vmatpush1.bf16.msra.mxu1 %v2882_v43  ;;  %2691 = vmatpush3.bf16.msra.mxu0 %v2885_v42 }
 0x5a2   : > { %1980 = vmatprep.subr.bf16.mxu1 %v2888_v44  ;;  %2692 = vmatprep.subr.bf16.mxu0 %v2889_v45 }
 0x5a5   : > { %1981 = vmatpush1.bf16.msra.mxu1 %v2886_v46  ;;  %2693 = vmatpush3.bf16.msra.mxu0 %v2889_v45 }
 0x5a6   : > { %1982 = vmatprep.subr.bf16.mxu1 %v2892_v47  ;;  %2694 = vmatprep.subr.bf16.mxu0 %v2893_v48 }
 0x5a9   : > { %1983 = vmatpush1.bf16.msra.mxu1 %v2890_v49  ;;  %2695 = vmatpush3.bf16.msra.mxu0 %v2893_v48 }
 0x5ac   : > { %2001 = vmatmul.mubr.bf16.vlgmr.msra.gmra.mrb[28].mxu1 %v1471_v28  ;;  %2697 = vmatmul.mubr.bf16.vlgmr.msra.gmra.mrb[36].mxu0 %v3543_v26 }
 0x5ad   : > { %2010 = vmatprep.mubr.bf16.mxu1 %v3070_v11 }
 0x5b4   : > { %2011 = vmatmul.mubr.bf16.gmra.mrb[32].mxu1 %v3543_v26 }
 0x65f   : > { %v1896_v61 = vpop.f32.mrb[20].mxu1  ;;  %v1949_v62 = vpop.f32.mrb[28].mxu0 }
 0x660   : > { %v1897_v63 = vadd.f32 %v1896_v61, %v1542_v57  ;;  %v1950_v0 = vadd.f32 %v1949_v62, %v3632_v58  ;;  %v1898_v1 = vpop.f32.mrb[21].mxu1  ;;  %v1951_v2 = vpop.f32.mrb[29].mxu0 }
 0x661   : > { %v1899_v3 = vadd.f32 %v1898_v1, %v3635_v59  ;;  %v1952_v4 = vadd.f32 %v1951_v2, %v3638_v60  ;;  %v1900_v5 = vpop.f32.mrb[22].mxu1  ;;  %v1953_v6 = vpop.f32.mrb[30].mxu0 }
 0x662   : > { %v2070_v7 = vsub.f32 0.0, %v1897_v63  ;;  %v2072_v8 = vsub.f32 0.0, %v1950_v0  ;;  %v1901_v9 = vadd.f32 %v1900_v5, %v1542_v57  ;;  %v1954_v10 = vadd.f32 %v1953_v6, %v3632_v58  ;;  %v1902_v11 = vpop.f32.mrb[23].mxu1  ;;  %v1955_v12 = vpop.f32.mrb[31].mxu0 }
 0x663   : > { %v2071_v13 = vsub.f32 0.0, %v1899_v3  ;;  %v2073_v14 = vsub.f32 0.0, %v1952_v4  ;;  %v1903_v15 = vadd.f32 %v1902_v11, %v3635_v59  ;;  %v1956_v16 = vadd.f32 %v1955_v12, %v3638_v60 }
 0x664   : > { %v2098_v17 = vmul.f32 1.442695, %v2070_v7  ;;  %v2102_v18 = vmul.f32 1.442695, %v2072_v8  ;;  %v2077_v19 = vsub.f32 0.0, %v1901_v9  ;;  %v2079_v20 = vsub.f32 0.0, %v1954_v10 }
 0x665   : > { %v2100_v21 = vmul.f32 1.442695, %v2071_v13  ;;  %v2104_v22 = vmul.f32 1.442695, %v2073_v14  ;;  %v2078_v23 = vsub.f32 0.0, %v1903_v15  ;;  %v2080_v24 = vsub.f32 0.0, %v1956_v16 }
 0x666   : > { %2894 = vpow2.f32 %v2098_v17  ;;  %v2112_v25 = vmul.f32 1.442695, %v2077_v19  ;;  %v2116_v26 = vmul.f32 1.442695, %v2079_v20  ;;  %v1557_v11 = vsub.s32 4, %v3619_v51 }
 0x667   : > { %2896 = vpow2.f32 %v2102_v18  ;;  %v1906_v27 = vpop.f32.mrb[24].mxu1  ;;  %v1959_v28 = vpop.f32.mrb[32].mxu0  ;;  %v2114_v29 = vmul.f32 1.442695, %v2078_v23  ;;  %v2118_v34 = vmul.f32 1.442695, %v2080_v24 }
 0x668   : > { %2898 = vpow2.f32 %v2100_v21  ;;  %v1907_v30 = vadd.f32 %v1906_v27, %v1542_v57  ;;  %v1960_v31 = vadd.f32 %v1959_v28, %v3632_v58  ;;  %v1908_v32 = vpop.f32.mrb[25].mxu1  ;;  %v1961_v33 = vpop.f32.mrb[33].mxu0  ;;  %v1565_v14 = vsub.s32 6, %v3619_v51 }
 0x669   : > { %2900 = vpow2.f32 %v2104_v22  ;;  %v1909_v35 = vadd.f32 %v1908_v32, %v3635_v59  ;;  %v1962_v36 = vadd.f32 %v1961_v33, %v3638_v60  ;;  %v1910_v37 = vpop.f32.mrb[26].mxu1  ;;  %v1963_v38 = vpop.f32.mrb[34].mxu0  ;;  %v3661_v22 = vrot.slane %v3626_v54, %v1557_v11 }
 0x66a   : > { %2902 = vpow2.f32 %v2112_v25  ;;  %v2084_v39 = vsub.f32 0.0, %v1907_v30  ;;  %v2086_v40 = vsub.f32 0.0, %v1960_v31  ;;  %v1911_v41 = vadd.f32 %v1910_v37, %v1542_v57  ;;  %v1912_v42 = vpop.f32.mrb[27].mxu1  ;;  %v1965_v43 = vpop.f32.mrb[35].mxu0 }
 0x66b   : > { %2904 = vpow2.f32 %v2116_v26  ;;  %v2085_v44 = vsub.f32 0.0, %v1909_v35  ;;  %v2087_v45 = vsub.f32 0.0, %v1962_v36  ;;  %v1964_v2 = vadd.f32 %v1963_v38, %v3632_v58 }
 0x66c   : > { %2906 = vpow2.f32 %v2114_v29  ;;  %v2126_v46 = vmul.f32 1.442695, %v2084_v39  ;;  %v2130_v47 = vmul.f32 1.442695, %v2086_v40  ;;  %v2091_v48 = vsub.f32 0.0, %v1911_v41 }
 0x66d   : > { %2908 = vpow2.f32 %v2118_v34  ;;  %v2128_v49 = vmul.f32 1.442695, %v2085_v44  ;;  %v2132_v50 = vmul.f32 1.442695, %v2087_v45  ;;  %v1913_v5 = vadd.f32 %v1912_v42, %v3635_v59 }
 0x66e   : > { %2910 = vpow2.f32 %v2126_v46  ;;  %v2140_v52 = vmul.f32 1.442695, %v2091_v48  ;;  %v1966_v8 = vadd.f32 %v1965_v43, %v3638_v60  ;;  %v2093_v13 = vsub.f32 0.0, %v1964_v2 }
 0x66f   : > { %2912 = vpow2.f32 %v2130_v47  ;;  %v2092_v16 = vsub.f32 0.0, %v1913_v5  ;;  %v1561_v60 = vsub.s32 5, %v3619_v51  ;;  %v1566_v26 = vrot.slane %v3626_v54, %v1565_v14 }
 0x670   : > { %v2895_v53 = vpop.eup %2894  ;;  %2914 = vpow2.f32 %v2128_v49  ;;  %v2094_v19 = vsub.f32 0.0, %v1966_v8  ;;  %v2144_v25 = vmul.f32 1.442695, %v2093_v13 }
 0x671   : > { %v2897_v55 = vpop.eup %2896  ;;  %v2154_v56 = vadd.f32 1.0, %v2895_v53  ;;  %2916 = vpow2.f32 %v2132_v50  ;;  %v2142_v28 = vmul.f32 1.442695, %v2092_v16  ;;  %v3665_v29 = vrot.slane %v3626_v54, %v1561_v60 }
 0x672   : > { %v2899_v57 = vpop.eup %2898  ;;  %v2156_v61 = vadd.f32 1.0, %v2897_v55  ;;  %2918 = vpow2.f32 %v2140_v52  ;;  %v2146_v31 = vmul.f32 1.442695, %v2094_v19 }
 0x673   : > { %v2901_v62 = vpop.eup %2900  ;;  %2920 = vrcp.f32 %v2154_v56  ;;  %v2155_v63 = vadd.f32 1.0, %v2899_v57 }
 0x674   : > { %v2903_v0 = vpop.eup %2902  ;;  %2922 = vrcp.f32 %v2156_v61  ;;  %v2157_v1 = vadd.f32 1.0, %v2901_v62 }
 0x675   : > { %v2905_v3 = vpop.eup %2904  ;;  %2924 = vrcp.f32 %v2155_v63  ;;  %v2161_v4 = vadd.f32 1.0, %v2903_v0 }
 0x676   : > { %v2907_v6 = vpop.eup %2906  ;;  %2926 = vrcp.f32 %v2157_v1  ;;  %v2163_v7 = vadd.f32 1.0, %v2905_v3 }
 0x677   : > { %v2909_v9 = vpop.eup %2908  ;;  %2928 = vrcp.f32 %v2161_v4  ;;  %v2162_v10 = vadd.f32 1.0, %v2907_v6 }
 0x678   : > { %v2911_v12 = vpop.eup %2910  ;;  %2930 = vrcp.f32 %v2163_v7  ;;  %v2164_v58 = vadd.f32 1.0, %v2909_v9 }
 0x679   : > { %v2913_v59 = vpop.eup %2912  ;;  %2932 = vrcp.f32 %v2162_v10  ;;  %v2168_v15 = vadd.f32 1.0, %v2911_v12 }
 0x67a   : > { %v2915_v17 = vpop.eup %2914  ;;  %2934 = vrcp.f32 %v2164_v58  ;;  %v2170_v18 = vadd.f32 1.0, %v2913_v59 }
 0x67b   : > { %v2917_v20 = vpop.eup %2916  ;;  %2936 = vrcp.f32 %v2168_v15  ;;  %v2169_v21 = vadd.f32 1.0, %v2915_v17 }
 0x67c   : > { %v2919_v23 = vpop.eup %2918  ;;  %2938 = vrcp.f32 %v2170_v18  ;;  %v2171_v24 = vadd.f32 1.0, %v2917_v20 }
 0x67d   : > { %v2921_v27 = vpop.eup %2920  ;;  %2940 = vrcp.f32 %v2169_v21  ;;  %v2175_v51 = vadd.f32 1.0, %v2919_v23 }
 0x67e   : > { %v2923_v30 = vpop.eup %2922  ;;  %2238 = vst [vmem:[%s3668_s14] sm:$0xff] %v2921_v27  ;;  %2942 = vrcp.f32 %v2171_v24 }
 0x67f   : > { %v2925_v32 = vpop.eup %2924  ;;  %2240 = vst [vmem:[%s3668_s14 + $0x10] sm:$0xff] %v2923_v30  ;;  %2944 = vrcp.f32 %v2175_v51  ;;  %v2002_v33 = vpop.f32.mrb[28].mxu1 }
 0x680   : > { %v2698_v34 = vpop.f32.mrb[36].mxu0  ;;  %v2927_v35 = vpop.eup %2926  ;;  %2239 = vst [vmem:[%s3668_s14 + $0x8] sm:$0xff] %v2925_v32  ;;  %2946 = vpow2.f32 %v2144_v25  ;;  %v2003_v54 = vadd.f32 %v2002_v33, %v3661_v22 }
 0x681   : > { %v2064_v36 = vadd.f32 %v2698_v34, %v1566_v26  ;;  %v2004_v37 = vpop.f32.mrb[29].mxu1  ;;  %v2055_v38 = vpop.f32.mrb[37].mxu0  ;;  %2241 = vst [vmem:[%s3668_s14 + $0x18] sm:$0xff] %v2927_v35  ;;  %2948 = vpow2.f32 %v2142_v28 }
 0x682   : > { %v2929_v39 = vpop.eup %2928  ;;  %v2005_v40 = vadd.f32 %v2004_v37, %v3665_v29  ;;  %v2056_v41 = vadd.f32 %v2055_v38, %v1566_v26  ;;  %v2006_v42 = vpop.f32.mrb[30].mxu1  ;;  %2950 = vpow2.f32 %v2146_v31  ;;  %v2074_v45 = vsub.f32 0.0, %v2003_v54 }
 0x683   : > { %v2699_v43 = vpop.f32.mrb[38].mxu0  ;;  %v2931_v44 = vpop.eup %2930  ;;  %2245 = vst [vmem:[%s3668_s14 + $0x38] sm:$0xff] %v2929_v39  ;;  %v2090_v46 = vsub.f32 0.0, %v2064_v36  ;;  %v2007_v47 = vadd.f32 %v2006_v42, %v3661_v22 }
 0x684   : > { %v2008_v48 = vpop.f32.mrb[31].mxu1  ;;  %v2058_v49 = vpop.f32.mrb[39].mxu0  ;;  %2247 = vst [vmem:[%s3668_s14 + $0x48] sm:$0xff] %v2931_v44  ;;  %v2075_v52 = vsub.f32 0.0, %v2005_v40  ;;  %v2076_v53 = vsub.f32 0.0, %v2056_v41  ;;  %v2067_v55 = vadd.f32 %v2699_v43, %v1566_v26 }
 0x685   : > { %v2933_v50 = vpop.eup %2932  ;;  %v2009_v56 = vadd.f32 %v2008_v48, %v3665_v29  ;;  %v2106_v61 = vmul.f32 1.442695, %v2074_v45  ;;  %v2138_v62 = vmul.f32 1.442695, %v2090_v46  ;;  %v2081_v63 = vsub.f32 0.0, %v2007_v47 }
 0x686   : > { %v2935_v57 = vpop.eup %2934  ;;  %2246 = vst [vmem:[%s3668_s14 + $0x40] sm:$0xff] %v2933_v50  ;;  %v2059_v0 = vadd.f32 %v2058_v49, %v1566_v26  ;;  %v2108_v2 = vmul.f32 1.442695, %v2075_v52  ;;  %v2110_v3 = vmul.f32 1.442695, %v2076_v53  ;;  %v2097_v4 = vsub.f32 0.0, %v2067_v55 }
 0x687   : > { %v2937_v1 = vpop.eup %2936  ;;  %2248 = vst [vmem:[%s3668_s14 + $0x50] sm:$0xff] %v2935_v57  ;;  %v2082_v5 = vsub.f32 0.0, %v2009_v56  ;;  %2952 = vpow2.f32 %v2106_v61  ;;  %v2120_v7 = vmul.f32 1.442695, %v2081_v63  ;;  %v2012_v10 = vpop.f32.mrb[32].mxu1 }
 0x688   : > { %v2939_v6 = vpop.eup %2938  ;;  %2252 = vst [vmem:[%s3668_s14 + $0x70] sm:$0xff] %v2937_v1  ;;  %2954 = vpow2.f32 %v2138_v62  ;;  %v2152_v9 = vmul.f32 1.442695, %v2097_v4  ;;  %v2083_v58 = vsub.f32 0.0, %v2059_v0  ;;  %v2013_v13 = vadd.f32 %v2012_v10, %v3661_v22  ;;  %v2014_v14 = vpop.f32.mrb[33].mxu1 }
 0x689   : > { %v2941_v8 = vpop.eup %2940  ;;  %2254 = vst [vmem:[%s3668_s14 + $0x80] sm:$0xff] %v2939_v6  ;;  %2956 = vpow2.f32 %v2108_v2  ;;  %v2122_v12 = vmul.f32 1.442695, %v2082_v5  ;;  %v2015_v15 = vadd.f32 %v2014_v14, %v3665_v29  ;;  %v2016_v16 = vpop.f32.mrb[34].mxu1 }
 0x68a   : > { %v2943_v11 = vpop.eup %2942  ;;  %2253 = vst [vmem:[%s3668_s14 + $0x78] sm:$0xff] %v2941_v8  ;;  %2958 = vpow2.f32 %v2110_v3  ;;  %v2088_v17 = vsub.f32 0.0, %v2013_v13  ;;  %v2018_v18 = vpop.f32.mrb[35].mxu1  ;;  %v2124_v25 = vmul.f32 1.442695, %v2083_v58  ;;  %v2017_v28 = vadd.f32 %v2016_v16, %v3661_v22 }
 0x68b   : > { %v2945_v59 = vpop.eup %2944  ;;  %2255 = vst [vmem:[%s3668_s14 + $0x88] sm:$0xff] %v2943_v11  ;;  %2960 = vpow2.f32 %v2120_v7  ;;  %v2089_v21 = vsub.f32 0.0, %v2015_v15  ;;  %v2019_v30 = vadd.f32 %v2018_v18, %v3665_v29 }
 0x68c   : > { %v2947_v60 = vpop.eup %2946  ;;  %2259 = vst [vmem:[%s3668_s14 + $0xa8] sm:$0xff] %v2945_v59  ;;  %2962 = vpow2.f32 %v2152_v9  ;;  %v2134_v27 = vmul.f32 1.442695, %v2088_v17  ;;  %v2095_v54 = vsub.f32 0.0, %v2017_v28 }
 0x68d   : > { %v2949_v19 = vpop.eup %2948  ;;  %v2177_v20 = vadd.f32 1.0, %v2947_v60  ;;  %2964 = vpow2.f32 %v2122_v12  ;;  %v2136_v51 = vmul.f32 1.442695, %v2089_v21  ;;  %v2096_v38 = vsub.f32 0.0, %v2019_v30 }
 0x68e   : > { %v2951_v23 = vpop.eup %2950  ;;  %v2176_v24 = vadd.f32 1.0, %v2949_v19  ;;  %v2148_v43 = vmul.f32 1.442695, %v2095_v54 }
 0x68f   : > { %2966 = vrcp.f32 %v2177_v20  ;;  %v2178_v26 = vadd.f32 1.0, %v2951_v23  ;;  %v2150_v46 = vmul.f32 1.442695, %v2096_v38 }
 0x690   : > { %2968 = vrcp.f32 %v2176_v24 }
 0x691   : > { %2970 = vrcp.f32 %v2178_v26  ;;  %v2953_v31 = vpop.eup %2952 }
 0x692   : > { %2972 = vpow2.f32 %v2124_v25  ;;  %v2955_v32 = vpop.eup %2954  ;;  %v2158_v33 = vadd.f32 1.0, %v2953_v31 }
 0x693   : > { %2974 = vpow2.f32 %v2134_v27  ;;  %v2957_v34 = vpop.eup %2956  ;;  %v2174_v35 = vadd.f32 1.0, %v2955_v32 }
 0x694   : > { %2976 = vpow2.f32 %v2136_v51  ;;  %v2959_v36 = vpop.eup %2958  ;;  %v2159_v37 = vadd.f32 1.0, %v2957_v34 }
 0x695   : > { %2978 = vrcp.f32 %v2158_v33  ;;  %v2961_v39 = vpop.eup %2960  ;;  %v2160_v22 = vadd.f32 1.0, %v2959_v36 }
 0x696   : > { %2980 = vrcp.f32 %v2174_v35  ;;  %v2963_v40 = vpop.eup %2962  ;;  %v2165_v29 = vadd.f32 1.0, %v2961_v39 }
 0x697   : > { %2982 = vrcp.f32 %v2159_v37  ;;  %v2965_v41 = vpop.eup %2964  ;;  %v2181_v42 = vadd.f32 1.0, %v2963_v40 }
 0x698   : > { %2984 = vrcp.f32 %v2160_v22  ;;  %v2166_v45 = vadd.f32 1.0, %v2965_v41 }
 0x699   : > { %v2967_v44 = vpop.eup %2966  ;;  %2986 = vrcp.f32 %v2165_v29 }
 0x69a   : > { %v2969_v47 = vpop.eup %2968  ;;  %2261 = vst [vmem:[%s3668_s14 + $0xb8] sm:$0xff] %v2967_v44  ;;  %2988 = vrcp.f32 %v2181_v42 }
 0x69b   : > { %v2971_v48 = vpop.eup %2970  ;;  %2260 = vst [vmem:[%s3668_s14 + $0xb0] sm:$0xff] %v2969_v47  ;;  %2990 = vrcp.f32 %v2166_v45 }
 0x69c   : > { %v2973_v49 = vpop.eup %2972  ;;  %2262 = vst [vmem:[%s3668_s14 + $0xc0] sm:$0xff] %v2971_v48  ;;  %2992 = vpow2.f32 %v2148_v43 }
 0x69d   : > { %v2975_v50 = vpop.eup %2974  ;;  %v2167_v52 = vadd.f32 1.0, %v2973_v49  ;;  %2994 = vpow2.f32 %v2150_v46 }
 0x69e   : > { %v2977_v53 = vpop.eup %2976  ;;  %v2172_v55 = vadd.f32 1.0, %v2975_v50 }
 0x69f   : > { %v2979_v56 = vpop.eup %2978  ;;  %2996 = vrcp.f32 %v2167_v52  ;;  %v2173_v57 = vadd.f32 1.0, %v2977_v53 }
 0x6a0   : > { %v2981_v61 = vpop.eup %2980  ;;  %2242 = vst [vmem:[%s3668_s14 + $0x20] sm:$0xff] %v2979_v56  ;;  %2998 = vrcp.f32 %v2172_v55 }
 0x6a1   : > { %v2983_v62 = vpop.eup %2982  ;;  %2258 = vst.msk [vmem:[%s3668_s14 + $0xa0] sm:$0xff] %vm779_vm0, %v2981_v61  ;;  %3000 = vrcp.f32 %v2173_v57 }
 0x6a2   : > { %v2985_v63 = vpop.eup %2984  ;;  %2243 = vst [vmem:[%s3668_s14 + $0x28] sm:$0xff] %v2983_v62 }
 0x6a3   : > { %v2987_v0 = vpop.eup %2986  ;;  %2244 = vst.msk [vmem:[%s3668_s14 + $0x30] sm:$0xff] %vm779_vm0, %v2985_v63 }
 0x6a4   : > { %v2989_v1 = vpop.eup %2988  ;;  %2249 = vst [vmem:[%s3668_s14 + $0x58] sm:$0xff] %v2987_v0 }
 0x6a5   : > { %v2991_v2 = vpop.eup %2990  ;;  %2265 = vst.msk [vmem:[%s3668_s14 + $0xd8] sm:$0xff] %vm779_vm0, %v2989_v1 }
 0x6a6   : > { %v2993_v3 = vpop.eup %2992  ;;  %2250 = vst [vmem:[%s3668_s14 + $0x60] sm:$0xff] %v2991_v2 }
 0x6a7   : > { %v2995_v4 = vpop.eup %2994  ;;  %v2179_v5 = vadd.f32 1.0, %v2993_v3 }
 0x6a8   : > { %v2180_v6 = vadd.f32 1.0, %v2995_v4 }
 0x6a9   : > { %v2997_v7 = vpop.eup %2996  ;;  %3002 = vrcp.f32 %v2179_v5 }
 0x6aa   : > { %v2999_v8 = vpop.eup %2998  ;;  %2251 = vst.msk [vmem:[%s3668_s14 + $0x68] sm:$0xff] %vm779_vm0, %v2997_v7  ;;  %3004 = vrcp.f32 %v2180_v6 }
 0x6ab   : > { %v3001_v9 = vpop.eup %3000  ;;  %2256 = vst [vmem:[%s3668_s14 + $0x90] sm:$0xff] %v2999_v8 }
 0x6ac   : > { %2257 = vst [vmem:[%s3668_s14 + $0x98] sm:$0xff] %v3001_v9 }
 0x6b3   : > { %v3003_v10 = vpop.eup %3002 }
 0x6b4   : > { %v3005_v11 = vpop.eup %3004  ;;  %2263 = vst [vmem:[%s3668_s14 + $0xc8] sm:$0xff] %v3003_v10 }
 0x6b5   : > { %2264 = vst [vmem:[%s3668_s14 + $0xd0] sm:$0xff] %v3005_v11 }
 0x6b6   : > { %3019 = shalt.err (!%p3016_p3)
}
 0x6b7   : > { %s3020_s24 = scalar_lea.hbm %s3715_s22, 3584  ;;  %s3024_s26 = scalar_lea.hbm %s3771_s9, 7168 }
 0x6b8   : > { %p3021_p4 = scmp.ne.s32.totalorder %s3715_s22, %s3020_s24  ;;  %p3025_p9 = scmp.lt.u32.totalorder %s3715_s22, %s3771_s9 }
 0x6b9   : > { %p3026_p10 = scmp.lt.u32.totalorder %s3024_s26, %s3020_s24  ;;  %p3028_p12 = scmp.lt.u32.totalorder %s3020_s24, %s3715_s22 }
 0x6ba   : > { %p3022_p7 = pnand %p3021_p4, %p3162_p5 }
 0x6bb   : > { %p3027_p11 = por %p3026_p10, %p3025_p9 }
 0x6bc   : > { %p3023_p8 = pneg %p3022_p7 }
 0x6bd   : > { %p3029_p13 = por %p3028_p12, %p3027_p11 }
 0x6bf   : > { %p3030_p0 = pnand %p3029_p13, %p3023_p8 }
 0x6c1   : > { %3033 = shalt.err (!%p3030_p0)
}
 0x6c2   : > { %s3072_s23 = smov 896   ;;  %s3073_s13 = smov 56  }
 0x6c3   : > { %2705 = dma.vmem_to_hbm [thread:$0]  (%p3162_p5), %s3710_s16, 3584, %s3715_s22, %s3721_s25, %s3072_s23, %s3072_s23, %s3073_s13  }
 0x6c4 PF: > { %p2711_p1 = scmp.ge.s32.totalorder %s3068_s12, 2  ;;  %s2296_s27 = sand.u32 1, %s3056_s30  }
 0x6c5   : > { %s2297_s28 = scalar_lea.sflag [#allocation3], %s2296_s27 }
 0x6c6   : > { %p2708_p2 = pnand %p2711_p1, %p3166_p6 }
 0x6c8   : > { %3051 = dma.done.wait (!%p2708_p2), %s2297_s28, 3584  }
 0x6c9   : > { %3053 = vsyncadd (!%p2708_p2), %s2297_s28, 4294963712  ;;  %p19_p3 = scmp.ge.s32.totalorder %s3149_s15, 4   ;;  %s3774_s30 = smov %s3060_s10 }
 0x6ca   : > { %s3775_s10 = smov %s3064_s11  ;;  %s3776_s11 = smov %s3160_s18 }
 0x6cb   : > { %s3777_s12 = smov %s3149_s15  ;;  %21 = sbr.rel (!%p19_p3) target bundleno = 3 (0x3), region = 91 }
 0x6d2   :  { %2302 = vsyncpa [#allocation3], 1 }
 0x6d3   :  { %2304 = vsyncpa [#allocation3 + $0x1], 1 }

</bundles_post_ra>
